<compile_context>
chip_gen: v7x
topology: tpu7x:2x2x1
jax: 0.10.0
libtpu: 0.0.40
codegen_flags: <defaults>
</compile_context>

<pallas_src>
import math

import jax
import jax.numpy as jnp
from jax import lax
from jax.experimental import pallas as pl
from jax.experimental.pallas import tpu as pltpu

# ---------------------------------------------------------------------------
# Config (small, self-consistent mini-BERT)
# ---------------------------------------------------------------------------
VOCAB = 50
MAX_POS = 16
HIDDEN = 32          # bert hidden_size (scaled down from 768)
NUM_HEADS = 4
HEAD_DIM = HIDDEN // NUM_HEADS
INTER = 64           # FFN intermediate size
NUM_LAYERS = 2
FC1_OUT = 256        # matches nn.Linear(hidden_size, 256)
NUM_CLASSES = 6
FC2_PAD = 128        # lane-dense padded logits width (sliced to 6 outside)
LN_EPS = 1e-12


def _layernorm(x, gamma, beta):
    mu = jnp.mean(x, axis=-1, keepdims=True)
    var = jnp.mean((x - mu) ** 2, axis=-1, keepdims=True)
    return (x - mu) * lax.rsqrt(var + LN_EPS) * gamma + beta


def _gelu_tanh(x):
    # TODO(synk): HF BERT uses exact erf-GELU; tanh approximation used here.
    c = math.sqrt(2.0 / math.pi)
    return 0.5 * x * (1.0 + jnp.tanh(c * (x + 0.044715 * x * x * x)))


def _mm(a, b):
    # bf16 MXU operands, f32 accumulation.
    return jnp.dot(a.astype(jnp.bfloat16), b.astype(jnp.bfloat16),
                   preferred_element_type=jnp.float32)


# ---------------------------------------------------------------------------
# Fully-fused BERT-classifier kernel.
#   grid step l == transformer layer l; last step also runs pooler + head.
# ---------------------------------------------------------------------------
def _bert_kernel(x_ref, bias_ref, mv_ref, g_ref, sel_ref,
                 embg_ref, embb_ref,
                 wqkv_ref, bqkv_ref, wo_ref, bo_ref,
                 ln1g_ref, ln1b_ref, wi_ref, bi_ref, wf_ref, bf_ref,
                 ln2g_ref, ln2b_ref,
                 pw_ref, pb_ref, w1_ref, b1_ref, w2_ref, b2_ref,
                 o_ref, h_ref):
    l = pl.program_id(0)

    # Embedding LayerNorm fused into the first grid step.
    @pl.when(l == 0)
    def _():
        h_ref[...] = _layernorm(x_ref[...], embg_ref[...], embb_ref[...])

    x = h_ref[...]                                   # (B*S, H), VMEM-resident

    # ---- fused QKV projection: one (H, 3H) matmul --------------------------
    qkv = _mm(x, wqkv_ref[l]) + bqkv_ref[l]          # (B*S, 3H), f32
    q = qkv[:, :HIDDEN]
    k = qkv[:, HIDDEN:2 * HIDDEN]
    v = qkv[:, 2 * HIDDEN:]

    mv = mv_ref[...]                                 # (nH*BS, H) 0/1 head mask

    # ---- batched multi-head attention, lane-dense (B*S, nH*B*S) ------------
    # kwide[h*BS+j, d] = k[j, d] if d belongs to head h else 0
    kwide = jnp.concatenate([k] * NUM_HEADS, axis=0) * mv
    s = lax.dot_general(q.astype(jnp.bfloat16), kwide.astype(jnp.bfloat16),
                        (((1,), (1,)), ((), ())),
                        preferred_element_type=jnp.float32)
    s = s * (1.0 / math.sqrt(HEAD_DIM)) + bias_ref[...]   # f32 bias add

    # Manual softmax per 16-wide head block (row max is a valid shift for all
    # blocks; per-head block sums via the block-diag-ones matmul).
    p = jnp.exp(s - jnp.max(s, axis=-1, keepdims=True))
    denom = jnp.dot(p, g_ref[...], preferred_element_type=jnp.float32)
    p = p * pl.reciprocal(denom, approx=True)

    # Context + output projection:
    #   rows h*BS+j of (vtall @ Wo) equal v_h[j] @ Wo[h*Dh:(h+1)*Dh, :]
    vtall = jnp.concatenate([v] * NUM_HEADS, axis=0) * mv    # (nH*BS, H)
    vw = _mm(vtall, wo_ref[l])                                # (nH*BS, H)
    attn = _mm(p, vw) + bo_ref[l]                             # (B*S, H)

    x = _layernorm(attn + x, ln1g_ref[l], ln1b_ref[l])

    # ---- feed-forward -------------------------------------------------------
    inter = _gelu_tanh(_mm(x, wi_ref[l]) + bi_ref[l])
    x = _layernorm(_mm(inter, wf_ref[l]) + bf_ref[l] + x,
                   ln2g_ref[l], ln2b_ref[l])

    h_ref[...] = x

    # ---- pooler + dropout(identity) + fc1/ReLU + fc2 epilogue ---------------
    @pl.when(l == NUM_LAYERS - 1)
    def _():
        # In-kernel token-0 selection: sel (B, B*S) with sel[b, b*S] = 1.
        pooled_in = jnp.dot(sel_ref[...], x, preferred_element_type=jnp.float32)
        pooled = jnp.tanh(_mm(pooled_in, pw_ref[...]) + pb_ref[...])
        # Dropout: identity (eval-mode, deterministic).
        hid = jnp.maximum(_mm(pooled, w1_ref[...]) + b1_ref[...], 0.0)
        o_ref[...] = (_mm(hid, w2_ref[...]) + b2_ref[...]).astype(o_ref.dtype)


# ---------------------------------------------------------------------------
# Deterministic parameter init (stacked per-layer weights for the layer grid)
# ---------------------------------------------------------------------------
def init_params(key):
    def nrm(k, shape):
        return jax.random.normal(k, shape, dtype=jnp.float32) * 0.02

    k = jax.random.split(key, 16)
    L = NUM_LAYERS

    fc2_w = jnp.zeros((FC1_OUT, FC2_PAD), jnp.float32)
    fc2_w = fc2_w.at[:, :NUM_CLASSES].set(nrm(k[7], (FC1_OUT, NUM_CLASSES)))

    return {
        # embeddings
        "word_emb": nrm(k[0], (VOCAB, HIDDEN)),
        "pos_emb": nrm(k[1], (MAX_POS, HIDDEN)),
        "type_emb": nrm(k[2], (2, HIDDEN)),
        "emb_ln_g": jnp.ones((1, HIDDEN), jnp.float32),
        "emb_ln_b": jnp.zeros((1, HIDDEN), jnp.float32),
        # stacked encoder layer weights (leading axis = layer)
        "enc_wqkv": nrm(k[3], (L, HIDDEN, 3 * HIDDEN)),   # [Wq | Wk | Wv]
        "enc_bqkv": jnp.zeros((L, 1, 3 * HIDDEN), jnp.float32),
        "enc_wo": nrm(k[4], (L, HIDDEN, HIDDEN)),
        "enc_bo": jnp.zeros((L, 1, HIDDEN), jnp.float32),
        "enc_ln1_g": jnp.ones((L, 1, HIDDEN), jnp.float32),
        "enc_ln1_b": jnp.zeros((L, 1, HIDDEN), jnp.float32),
        "enc_wi": nrm(k[5], (L, HIDDEN, INTER)),
        "enc_bi": jnp.zeros((L, 1, INTER), jnp.float32),
        "enc_wf": nrm(k[6], (L, INTER, HIDDEN)),
        "enc_bf": jnp.zeros((L, 1, HIDDEN), jnp.float32),
        "enc_ln2_g": jnp.ones((L, 1, HIDDEN), jnp.float32),
        "enc_ln2_b": jnp.zeros((L, 1, HIDDEN), jnp.float32),
        # pooler + classifier head
        "pool_w": nrm(k[8], (HIDDEN, HIDDEN)),
        "pool_b": jnp.zeros((1, HIDDEN), jnp.float32),
        "fc1_w": nrm(k[9], (HIDDEN, FC1_OUT)),
        "fc1_b": jnp.zeros((1, FC1_OUT), jnp.float32),
        "fc2_w": fc2_w,
        "fc2_b": jnp.zeros((1, FC2_PAD), jnp.float32),
    }


# ---------------------------------------------------------------------------
# Forward pass: embedding gather + mask construction in JAX, everything else
# (embedding LN, all layers, pooler, head) in ONE pallas_call.
# ---------------------------------------------------------------------------
def bert_classifier_forward(params, input_ids, attention_mask):
    B, S = input_ids.shape
    BS = B * S

    # Embedding lookup (gather stays in JAX glue; LN fused into the kernel).
    x = (params["word_emb"][input_ids]
         + params["pos_emb"][jnp.arange(S)][None, :, :]
         + params["type_emb"][0][None, None, :])            # (B, S, H)
    x2d = x.reshape(BS, HIDDEN).astype(jnp.float32)

    # Block-diagonal additive attention bias (B*S, B*S):
    #   same batch & attended key ->      0
    #   same batch & masked key   -> -1e4   (matches BERT's -10000)
    #   different batch           -> -1e9   (exp underflows to exactly 0)
    seg = jnp.repeat(jnp.arange(B, dtype=jnp.int32), S)
    same_batch = seg[:, None] == seg[None, :]
    key_ok = attention_mask.astype(jnp.float32).reshape(BS)
    attn_bias = jnp.where(same_batch,
                          (1.0 - key_ok)[None, :] * -10000.0,
                          -1e9).astype(jnp.float32)
    bias_tiled = jnp.tile(attn_bias, (1, NUM_HEADS))          # (BS, nH*BS)

    # Head mask (nH*BS, H): row block h keeps only columns of head h.
    row_head = jnp.repeat(jnp.arange(NUM_HEADS), BS)
    col_head = jnp.arange(HIDDEN) // HEAD_DIM
    mv = (row_head[:, None] == col_head[None, :]).astype(jnp.float32)

    # Block-diag-ones (nH*BS, nH*BS) for per-head softmax denominators.
    blk = jnp.arange(NUM_HEADS * BS) // BS
    g = (blk[:, None] == blk[None, :]).astype(jnp.float32)

    # Token-0 selector (B, B*S): sel[b, b*S] = 1.
    sel = (jnp.arange(B)[:, None] * S
           == jnp.arange(BS)[None, :]).astype(jnp.float32)

    operands = [
        x2d, bias_tiled, mv, g, sel,
        params["emb_ln_g"], params["emb_ln_b"],
        params["enc_wqkv"], params["enc_bqkv"],
        params["enc_wo"], params["enc_bo"],
        params["enc_ln1_g"], params["enc_ln1_b"],
        params["enc_wi"], params["enc_bi"],
        params["enc_wf"], params["enc_bf"],
        params["enc_ln2_g"], params["enc_ln2_b"],
        params["pool_w"], params["pool_b"],
        params["fc1_w"], params["fc1_b"],
        params["fc2_w"], params["fc2_b"],
    ]
    # Every operand is VMEM-resident across the whole layer grid (constant
    # block index), so each is DMA'd exactly once.
    in_specs = [pl.BlockSpec(op.shape, lambda l, nd=op.ndim: (0,) * nd)
                for op in operands]

    logits_padded = pl.pallas_call(
        _bert_kernel,
        out_shape=jax.ShapeDtypeStruct((B, FC2_PAD), jnp.float32),
        grid=(NUM_LAYERS,),
        in_specs=in_specs,
        out_specs=pl.BlockSpec((B, FC2_PAD), lambda l: (0, 0)),
        scratch_shapes=[pltpu.VMEM((BS, HIDDEN), jnp.float32)],
        compiler_params=pltpu.CompilerParams(
            dimension_semantics=("arbitrary",)),
    )(*operands)

    return logits_padded[:, :NUM_CLASSES]                     # (B, 6)


# ---------------------------------------------------------------------------
if __name__ == "__main__":
    B, S = 2, 8
    key = jax.random.PRNGKey(0)
    k_param, k_ids = jax.random.split(key)

    params = init_params(k_param)
    input_ids = jax.random.randint(k_ids, (B, S), 0, VOCAB, dtype=jnp.int32)
    attention_mask = jnp.array([[1] * S, [1] * (S - 2) + [0] * 2],
                               dtype=jnp.int32)

    logits = jax.jit(bert_classifier_forward)(params, input_ids, attention_mask)
    jax.block_until_ready(logits)
    assert logits.shape == (B, NUM_CLASSES)
    assert bool(jnp.all(jnp.isfinite(logits)))
    print("KERNEL_OK")
</pallas_src>

<mosaic_0001>
module attributes {stable_mosaic.version = 11 : i64} {
  func.func @_bert_kernel(%arg0: i32, %arg1: memref<16x32xf32, #tpu.memory_space<vmem>>, %arg2: memref<16x64xf32, #tpu.memory_space<vmem>>, %arg3: memref<64x32xf32, #tpu.memory_space<vmem>>, %arg4: memref<64x64xf32, #tpu.memory_space<vmem>>, %arg5: memref<2x16xf32, #tpu.memory_space<vmem>>, %arg6: memref<1x32xf32, #tpu.memory_space<vmem>>, %arg7: memref<1x32xf32, #tpu.memory_space<vmem>>, %arg8: memref<2x32x96xf32, #tpu.memory_space<vmem>>, %arg9: memref<2x1x96xf32, #tpu.memory_space<vmem>>, %arg10: memref<2x32x32xf32, #tpu.memory_space<vmem>>, %arg11: memref<2x1x32xf32, #tpu.memory_space<vmem>>, %arg12: memref<2x1x32xf32, #tpu.memory_space<vmem>>, %arg13: memref<2x1x32xf32, #tpu.memory_space<vmem>>, %arg14: memref<2x32x64xf32, #tpu.memory_space<vmem>>, %arg15: memref<2x1x64xf32, #tpu.memory_space<vmem>>, %arg16: memref<2x64x32xf32, #tpu.memory_space<vmem>>, %arg17: memref<2x1x32xf32, #tpu.memory_space<vmem>>, %arg18: memref<2x1x32xf32, #tpu.memory_space<vmem>>, %arg19: memref<2x1x32xf32, #tpu.memory_space<vmem>>, %arg20: memref<32x32xf32, #tpu.memory_space<vmem>>, %arg21: memref<1x32xf32, #tpu.memory_space<vmem>>, %arg22: memref<32x256xf32, #tpu.memory_space<vmem>>, %arg23: memref<1x256xf32, #tpu.memory_space<vmem>>, %arg24: memref<256x128xf32, #tpu.memory_space<vmem>>, %arg25: memref<1x128xf32, #tpu.memory_space<vmem>>, %arg26: memref<2x128xf32, #tpu.memory_space<vmem>>, %arg27: memref<16x32xf32, #tpu.memory_space<vmem>>) attributes {dimension_semantics = [#tpu.dimension_semantics<arbitrary>], iteration_bounds = array<i64: 2>, scalar_prefetch = 0 : i64, scratch_operands = 1 : i64, tpu.core_type = #tpu.core_type<tc>, window_params = [{pipeline_mode = #tpu.pipeline_mode<synchronous>, transform_indices = @transform_0, window_bounds = array<i64: 16, 32>}, {pipeline_mode = #tpu.pipeline_mode<synchronous>, transform_indices = @transform_1, window_bounds = array<i64: 16, 64>}, {pipeline_mode = #tpu.pipeline_mode<synchronous>, transform_indices = @transform_2, window_bounds = array<i64: 64, 32>}, {pipeline_mode = #tpu.pipeline_mode<synchronous>, transform_indices = @transform_3, window_bounds = array<i64: 64, 64>}, {pipeline_mode = #tpu.pipeline_mode<synchronous>, transform_indices = @transform_4, window_bounds = array<i64: 2, 16>}, {pipeline_mode = #tpu.pipeline_mode<synchronous>, transform_indices = @transform_5, window_bounds = array<i64: 1, 32>}, {pipeline_mode = #tpu.pipeline_mode<synchronous>, transform_indices = @transform_6, window_bounds = array<i64: 1, 32>}, {pipeline_mode = #tpu.pipeline_mode<synchronous>, transform_indices = @transform_7, window_bounds = array<i64: 2, 32, 96>}, {pipeline_mode = #tpu.pipeline_mode<synchronous>, transform_indices = @transform_8, window_bounds = array<i64: 2, 1, 96>}, {pipeline_mode = #tpu.pipeline_mode<synchronous>, transform_indices = @transform_9, window_bounds = array<i64: 2, 32, 32>}, {pipeline_mode = #tpu.pipeline_mode<synchronous>, transform_indices = @transform_10, window_bounds = array<i64: 2, 1, 32>}, {pipeline_mode = #tpu.pipeline_mode<synchronous>, transform_indices = @transform_11, window_bounds = array<i64: 2, 1, 32>}, {pipeline_mode = #tpu.pipeline_mode<synchronous>, transform_indices = @transform_12, window_bounds = array<i64: 2, 1, 32>}, {pipeline_mode = #tpu.pipeline_mode<synchronous>, transform_indices = @transform_13, window_bounds = array<i64: 2, 32, 64>}, {pipeline_mode = #tpu.pipeline_mode<synchronous>, transform_indices = @transform_14, window_bounds = array<i64: 2, 1, 64>}, {pipeline_mode = #tpu.pipeline_mode<synchronous>, transform_indices = @transform_15, window_bounds = array<i64: 2, 64, 32>}, {pipeline_mode = #tpu.pipeline_mode<synchronous>, transform_indices = @transform_16, window_bounds = array<i64: 2, 1, 32>}, {pipeline_mode = #tpu.pipeline_mode<synchronous>, transform_indices = @transform_17, window_bounds = array<i64: 2, 1, 32>}, {pipeline_mode = #tpu.pipeline_mode<synchronous>, transform_indices = @transform_18, window_bounds = array<i64: 2, 1, 32>}, {pipeline_mode = #tpu.pipeline_mode<synchronous>, transform_indices = @transform_19, window_bounds = array<i64: 32, 32>}, {pipeline_mode = #tpu.pipeline_mode<synchronous>, transform_indices = @transform_20, window_bounds = array<i64: 1, 32>}, {pipeline_mode = #tpu.pipeline_mode<synchronous>, transform_indices = @transform_21, window_bounds = array<i64: 32, 256>}, {pipeline_mode = #tpu.pipeline_mode<synchronous>, transform_indices = @transform_22, window_bounds = array<i64: 1, 256>}, {pipeline_mode = #tpu.pipeline_mode<synchronous>, transform_indices = @transform_23, window_bounds = array<i64: 256, 128>}, {pipeline_mode = #tpu.pipeline_mode<synchronous>, transform_indices = @transform_24, window_bounds = array<i64: 1, 128>}, {pipeline_mode = #tpu.pipeline_mode<synchronous>, transform_indices = @transform_25, window_bounds = array<i64: 2, 128>}]} {
    %c0_i32 = arith.constant 0 : i32
    %0 = arith.cmpi eq, %arg0, %c0_i32 : i32
    %1 = arith.extui %0 : i1 to i32
    %c0_i32_0 = arith.constant 0 : i32
    %2 = arith.cmpi ne, %1, %c0_i32_0 : i32
    scf.if %2 {
      %c0_57 = arith.constant 0 : index
      %c0_58 = arith.constant 0 : index
      %150 = vector.load %arg1[%c0_57, %c0_58] : memref<16x32xf32, #tpu.memory_space<vmem>>, vector<16x32xf32>
      %c0_59 = arith.constant 0 : index
      %c0_60 = arith.constant 0 : index
      %151 = vector.load %arg6[%c0_59, %c0_60] : memref<1x32xf32, #tpu.memory_space<vmem>>, vector<1x32xf32>
      %c0_61 = arith.constant 0 : index
      %c0_62 = arith.constant 0 : index
      %152 = vector.load %arg7[%c0_61, %c0_62] : memref<1x32xf32, #tpu.memory_space<vmem>>, vector<1x32xf32>
      %cst_63 = arith.constant dense<0.000000e+00> : vector<16xf32>
      %153 = vector.multi_reduction <add>, %150, %cst_63 [1] : vector<16x32xf32> to vector<16xf32>
      %154 = vector.shape_cast %153 : vector<16xf32> to vector<16x1xf32>
      %cst_64 = arith.constant 3.200000e+01 : f32
      %155 = vector.broadcast %cst_64 : f32 to vector<16x1xf32>
      %156 = arith.divf %154, %155 : vector<16x1xf32>
      %157 = vector.broadcast %156 : vector<16x1xf32> to vector<16x32xf32>
      %158 = arith.subf %150, %157 : vector<16x32xf32>
      %159 = arith.mulf %158, %158 : vector<16x32xf32>
      %cst_65 = arith.constant dense<0.000000e+00> : vector<16xf32>
      %160 = vector.multi_reduction <add>, %159, %cst_65 [1] : vector<16x32xf32> to vector<16xf32>
      %161 = vector.shape_cast %160 : vector<16xf32> to vector<16x1xf32>
      %cst_66 = arith.constant 3.200000e+01 : f32
      %162 = vector.broadcast %cst_66 : f32 to vector<16x1xf32>
      %163 = arith.divf %161, %162 : vector<16x1xf32>
      %164 = vector.broadcast %156 : vector<16x1xf32> to vector<16x32xf32>
      %165 = arith.subf %150, %164 : vector<16x32xf32>
      %cst_67 = arith.constant 9.99999996E-13 : f32
      %166 = vector.broadcast %cst_67 : f32 to vector<16x1xf32>
      %167 = arith.addf %163, %166 : vector<16x1xf32>
      %168 = math.rsqrt %167 : vector<16x1xf32>
      %169 = vector.broadcast %168 : vector<16x1xf32> to vector<16x32xf32>
      %170 = arith.mulf %165, %169 : vector<16x32xf32>
      %171 = vector.broadcast %151 : vector<1x32xf32> to vector<16x32xf32>
      %172 = arith.mulf %170, %171 : vector<16x32xf32>
      %173 = vector.broadcast %152 : vector<1x32xf32> to vector<16x32xf32>
      %174 = arith.addf %172, %173 : vector<16x32xf32>
      %c0_68 = arith.constant 0 : index
      %c0_69 = arith.constant 0 : index
      %175 = vector.load %arg27[%c0_68, %c0_69] : memref<16x32xf32, #tpu.memory_space<vmem>>, vector<16x32xf32>
      tpu.vector_store %arg27[%c0_68, %c0_69], %174 {strides = array<i32>} : memref<16x32xf32, #tpu.memory_space<vmem>>, vector<16x32xf32>,
    } else {
    }
    %c0 = arith.constant 0 : index
    %c0_1 = arith.constant 0 : index
    %3 = vector.load %arg27[%c0, %c0_1] : memref<16x32xf32, #tpu.memory_space<vmem>>, vector<16x32xf32>
    %4 = arith.index_cast %arg0 : i32 to index
    %c0_2 = arith.constant 0 : index
    %c0_3 = arith.constant 0 : index
    %5 = vector.load %arg8[%4, %c0_2, %c0_3] : memref<2x32x96xf32, #tpu.memory_space<vmem>>, vector<1x32x96xf32>
    %6 = vector.shape_cast %5 : vector<1x32x96xf32> to vector<32x96xf32>
    %7 = arith.truncf %3 : vector<16x32xf32> to vector<16x32xbf16>
    %8 = arith.truncf %6 : vector<32x96xf32> to vector<32x96xbf16>
    %cst = arith.constant dense<0.000000e+00> : vector<16x96xf32>
    %9 = tpu.matmul %7, %8, %cst {dimension_numbers = #tpu.dot_dimension_numbers<[1], [0], [0], [1], [0, 0, 1, 1], [], []>} : vector<16x32xbf16>, vector<32x96xbf16>, vector<16x96xf32> -> vector<16x96xf32>
    %10 = arith.index_cast %arg0 : i32 to index
    %c0_4 = arith.constant 0 : index
    %c0_5 = arith.constant 0 : index
    %11 = vector.load %arg9[%10, %c0_4, %c0_5] : memref<2x1x96xf32, #tpu.memory_space<vmem>>, vector<1x1x96xf32>
    %12 = vector.shape_cast %11 : vector<1x1x96xf32> to vector<1x96xf32>
    %13 = vector.broadcast %12 : vector<1x96xf32> to vector<16x96xf32>
    %14 = arith.addf %9, %13 : vector<16x96xf32>
    %15 = vector.extract_strided_slice %14 {offsets = [0, 0], sizes = [16, 32], strides = [1, 1]} : vector<16x96xf32> to vector<16x32xf32>
    %16 = vector.extract_strided_slice %14 {offsets = [0, 32], sizes = [16, 32], strides = [1, 1]} : vector<16x96xf32> to vector<16x32xf32>
    %17 = vector.extract_strided_slice %14 {offsets = [0, 64], sizes = [16, 32], strides = [1, 1]} : vector<16x96xf32> to vector<16x32xf32>
    %c0_6 = arith.constant 0 : index
    %c0_7 = arith.constant 0 : index
    %18 = vector.load %arg3[%c0_6, %c0_7] : memref<64x32xf32, #tpu.memory_space<vmem>>, vector<64x32xf32>
    %19 = tpu.concatenate %16, %16, %16, %16 in 0 : vector<16x32xf32>, vector<16x32xf32>, vector<16x32xf32>, vector<16x32xf32> -> vector<64x32xf32>
    %20 = arith.mulf %19, %18 : vector<64x32xf32>
    %21 = arith.truncf %15 : vector<16x32xf32> to vector<16x32xbf16>
    %22 = arith.truncf %20 : vector<64x32xf32> to vector<64x32xbf16>
    %cst_8 = arith.constant dense<0.000000e+00> : vector<16x64xf32>
    %23 = tpu.matmul %21, %22, %cst_8 {dimension_numbers = #tpu.dot_dimension_numbers<[1], [1], [0], [0], [0, 0, 1, 0], [], []>} : vector<16x32xbf16>, vector<64x32xbf16>, vector<16x64xf32> -> vector<16x64xf32>
    %cst_9 = arith.constant 0.353553385 : f32
    %24 = vector.broadcast %cst_9 : f32 to vector<16x64xf32>
    %25 = arith.mulf %23, %24 : vector<16x64xf32>
    %c0_10 = arith.constant 0 : index
    %c0_11 = arith.constant 0 : index
    %26 = vector.load %arg2[%c0_10, %c0_11] : memref<16x64xf32, #tpu.memory_space<vmem>>, vector<16x64xf32>
    %27 = arith.addf %25, %26 : vector<16x64xf32>
    %cst_12 = arith.constant dense<0xFF800000> : vector<16xf32>
    %28 = vector.multi_reduction <maximumf>, %27, %cst_12 [1] : vector<16x64xf32> to vector<16xf32>
    %29 = vector.shape_cast %28 : vector<16xf32> to vector<16x1xf32>
    %30 = vector.broadcast %29 : vector<16x1xf32> to vector<16x64xf32>
    %31 = arith.subf %27, %30 : vector<16x64xf32>
    %32 = math.exp %31 : vector<16x64xf32>
    %c0_13 = arith.constant 0 : index
    %c0_14 = arith.constant 0 : index
    %33 = vector.load %arg4[%c0_13, %c0_14] : memref<64x64xf32, #tpu.memory_space<vmem>>, vector<64x64xf32>
    %cst_15 = arith.constant dense<0.000000e+00> : vector<16x64xf32>
    %34 = tpu.matmul %32, %33, %cst_15 {dimension_numbers = #tpu.dot_dimension_numbers<[1], [0], [0], [1], [0, 0, 1, 1], [], []>} : vector<16x64xf32>, vector<64x64xf32>, vector<16x64xf32> -> vector<16x64xf32>
    %35 = tpu.reciprocal %34 {approx = true} : vector<16x64xf32> -> vector<16x64xf32>
    %36 = arith.mulf %32, %35 : vector<16x64xf32>
    %37 = tpu.concatenate %17, %17, %17, %17 in 0 : vector<16x32xf32>, vector<16x32xf32>, vector<16x32xf32>, vector<16x32xf32> -> vector<64x32xf32>
    %38 = arith.mulf %37, %18 : vector<64x32xf32>
    %39 = arith.index_cast %arg0 : i32 to index
    %c0_16 = arith.constant 0 : index
    %c0_17 = arith.constant 0 : index
    %40 = vector.load %arg10[%39, %c0_16, %c0_17] : memref<2x32x32xf32, #tpu.memory_space<vmem>>, vector<1x32x32xf32>
    %41 = vector.shape_cast %40 : vector<1x32x32xf32> to vector<32x32xf32>
    %42 = arith.truncf %38 : vector<64x32xf32> to vector<64x32xbf16>
    %43 = arith.truncf %41 : vector<32x32xf32> to vector<32x32xbf16>
    %cst_18 = arith.constant dense<0.000000e+00> : vector<64x32xf32>
    %44 = tpu.matmul %42, %43, %cst_18 {dimension_numbers = #tpu.dot_dimension_numbers<[1], [0], [0], [1], [0, 0, 1, 1], [], []>} : vector<64x32xbf16>, vector<32x32xbf16>, vector<64x32xf32> -> vector<64x32xf32>
    %45 = arith.truncf %36 : vector<16x64xf32> to vector<16x64xbf16>
    %46 = arith.truncf %44 : vector<64x32xf32> to vector<64x32xbf16>
    %cst_19 = arith.constant dense<0.000000e+00> : vector<16x32xf32>
    %47 = tpu.matmul %45, %46, %cst_19 {dimension_numbers = #tpu.dot_dimension_numbers<[1], [0], [0], [1], [0, 0, 1, 1], [], []>} : vector<16x64xbf16>, vector<64x32xbf16>, vector<16x32xf32> -> vector<16x32xf32>
    %48 = arith.index_cast %arg0 : i32 to index
    %c0_20 = arith.constant 0 : index
    %c0_21 = arith.constant 0 : index
    %49 = vector.load %arg11[%48, %c0_20, %c0_21] : memref<2x1x32xf32, #tpu.memory_space<vmem>>, vector<1x1x32xf32>
    %50 = vector.shape_cast %49 : vector<1x1x32xf32> to vector<1x32xf32>
    %51 = vector.broadcast %50 : vector<1x32xf32> to vector<16x32xf32>
    %52 = arith.addf %47, %51 : vector<16x32xf32>
    %53 = arith.addf %52, %3 : vector<16x32xf32>
    %54 = arith.index_cast %arg0 : i32 to index
    %c0_22 = arith.constant 0 : index
    %c0_23 = arith.constant 0 : index
    %55 = vector.load %arg12[%54, %c0_22, %c0_23] : memref<2x1x32xf32, #tpu.memory_space<vmem>>, vector<1x1x32xf32>
    %56 = vector.shape_cast %55 : vector<1x1x32xf32> to vector<1x32xf32>
    %57 = arith.index_cast %arg0 : i32 to index
    %c0_24 = arith.constant 0 : index
    %c0_25 = arith.constant 0 : index
    %58 = vector.load %arg13[%57, %c0_24, %c0_25] : memref<2x1x32xf32, #tpu.memory_space<vmem>>, vector<1x1x32xf32>
    %59 = vector.shape_cast %58 : vector<1x1x32xf32> to vector<1x32xf32>
    %cst_26 = arith.constant dense<0.000000e+00> : vector<16xf32>
    %60 = vector.multi_reduction <add>, %53, %cst_26 [1] : vector<16x32xf32> to vector<16xf32>
    %61 = vector.shape_cast %60 : vector<16xf32> to vector<16x1xf32>
    %cst_27 = arith.constant 3.200000e+01 : f32
    %62 = vector.broadcast %cst_27 : f32 to vector<16x1xf32>
    %63 = arith.divf %61, %62 : vector<16x1xf32>
    %64 = vector.broadcast %63 : vector<16x1xf32> to vector<16x32xf32>
    %65 = arith.subf %53, %64 : vector<16x32xf32>
    %66 = arith.mulf %65, %65 : vector<16x32xf32>
    %cst_28 = arith.constant dense<0.000000e+00> : vector<16xf32>
    %67 = vector.multi_reduction <add>, %66, %cst_28 [1] : vector<16x32xf32> to vector<16xf32>
    %68 = vector.shape_cast %67 : vector<16xf32> to vector<16x1xf32>
    %cst_29 = arith.constant 3.200000e+01 : f32
    %69 = vector.broadcast %cst_29 : f32 to vector<16x1xf32>
    %70 = arith.divf %68, %69 : vector<16x1xf32>
    %71 = vector.broadcast %63 : vector<16x1xf32> to vector<16x32xf32>
    %72 = arith.subf %53, %71 : vector<16x32xf32>
    %cst_30 = arith.constant 9.99999996E-13 : f32
    %73 = vector.broadcast %cst_30 : f32 to vector<16x1xf32>
    %74 = arith.addf %70, %73 : vector<16x1xf32>
    %75 = math.rsqrt %74 : vector<16x1xf32>
    %76 = vector.broadcast %75 : vector<16x1xf32> to vector<16x32xf32>
    %77 = arith.mulf %72, %76 : vector<16x32xf32>
    %78 = vector.broadcast %56 : vector<1x32xf32> to vector<16x32xf32>
    %79 = arith.mulf %77, %78 : vector<16x32xf32>
    %80 = vector.broadcast %59 : vector<1x32xf32> to vector<16x32xf32>
    %81 = arith.addf %79, %80 : vector<16x32xf32>
    %82 = arith.index_cast %arg0 : i32 to index
    %c0_31 = arith.constant 0 : index
    %c0_32 = arith.constant 0 : index
    %83 = vector.load %arg14[%82, %c0_31, %c0_32] : memref<2x32x64xf32, #tpu.memory_space<vmem>>, vector<1x32x64xf32>
    %84 = vector.shape_cast %83 : vector<1x32x64xf32> to vector<32x64xf32>
    %85 = arith.truncf %81 : vector<16x32xf32> to vector<16x32xbf16>
    %86 = arith.truncf %84 : vector<32x64xf32> to vector<32x64xbf16>
    %cst_33 = arith.constant dense<0.000000e+00> : vector<16x64xf32>
    %87 = tpu.matmul %85, %86, %cst_33 {dimension_numbers = #tpu.dot_dimension_numbers<[1], [0], [0], [1], [0, 0, 1, 1], [], []>} : vector<16x32xbf16>, vector<32x64xbf16>, vector<16x64xf32> -> vector<16x64xf32>
    %88 = arith.index_cast %arg0 : i32 to index
    %c0_34 = arith.constant 0 : index
    %c0_35 = arith.constant 0 : index
    %89 = vector.load %arg15[%88, %c0_34, %c0_35] : memref<2x1x64xf32, #tpu.memory_space<vmem>>, vector<1x1x64xf32>
    %90 = vector.shape_cast %89 : vector<1x1x64xf32> to vector<1x64xf32>
    %91 = vector.broadcast %90 : vector<1x64xf32> to vector<16x64xf32>
    %92 = arith.addf %87, %91 : vector<16x64xf32>
    %cst_36 = arith.constant 5.000000e-01 : f32
    %93 = vector.broadcast %cst_36 : f32 to vector<16x64xf32>
    %94 = arith.mulf %93, %92 : vector<16x64xf32>
    %cst_37 = arith.constant 4.471500e-02 : f32
    %95 = vector.broadcast %cst_37 : f32 to vector<16x64xf32>
    %96 = arith.mulf %95, %92 : vector<16x64xf32>
    %97 = arith.mulf %96, %92 : vector<16x64xf32>
    %98 = arith.mulf %97, %92 : vector<16x64xf32>
    %99 = arith.addf %92, %98 : vector<16x64xf32>
    %cst_38 = arith.constant 0.797884583 : f32
    %100 = vector.broadcast %cst_38 : f32 to vector<16x64xf32>
    %101 = arith.mulf %100, %99 : vector<16x64xf32>
    %102 = math.tanh %101 : vector<16x64xf32>
    %cst_39 = arith.constant 1.000000e+00 : f32
    %103 = vector.broadcast %cst_39 : f32 to vector<16x64xf32>
    %104 = arith.addf %103, %102 : vector<16x64xf32>
    %105 = arith.mulf %94, %104 : vector<16x64xf32>
    %106 = arith.index_cast %arg0 : i32 to index
    %c0_40 = arith.constant 0 : index
    %c0_41 = arith.constant 0 : index
    %107 = vector.load %arg16[%106, %c0_40, %c0_41] : memref<2x64x32xf32, #tpu.memory_space<vmem>>, vector<1x64x32xf32>
    %108 = vector.shape_cast %107 : vector<1x64x32xf32> to vector<64x32xf32>
    %109 = arith.truncf %105 : vector<16x64xf32> to vector<16x64xbf16>
    %110 = arith.truncf %108 : vector<64x32xf32> to vector<64x32xbf16>
    %cst_42 = arith.constant dense<0.000000e+00> : vector<16x32xf32>
    %111 = tpu.matmul %109, %110, %cst_42 {dimension_numbers = #tpu.dot_dimension_numbers<[1], [0], [0], [1], [0, 0, 1, 1], [], []>} : vector<16x64xbf16>, vector<64x32xbf16>, vector<16x32xf32> -> vector<16x32xf32>
    %112 = arith.index_cast %arg0 : i32 to index
    %c0_43 = arith.constant 0 : index
    %c0_44 = arith.constant 0 : index
    %113 = vector.load %arg17[%112, %c0_43, %c0_44] : memref<2x1x32xf32, #tpu.memory_space<vmem>>, vector<1x1x32xf32>
    %114 = vector.shape_cast %113 : vector<1x1x32xf32> to vector<1x32xf32>
    %115 = vector.broadcast %114 : vector<1x32xf32> to vector<16x32xf32>
    %116 = arith.addf %111, %115 : vector<16x32xf32>
    %117 = arith.addf %116, %81 : vector<16x32xf32>
    %118 = arith.index_cast %arg0 : i32 to index
    %c0_45 = arith.constant 0 : index
    %c0_46 = arith.constant 0 : index
    %119 = vector.load %arg18[%118, %c0_45, %c0_46] : memref<2x1x32xf32, #tpu.memory_space<vmem>>, vector<1x1x32xf32>
    %120 = vector.shape_cast %119 : vector<1x1x32xf32> to vector<1x32xf32>
    %121 = arith.index_cast %arg0 : i32 to index
    %c0_47 = arith.constant 0 : index
    %c0_48 = arith.constant 0 : index
    %122 = vector.load %arg19[%121, %c0_47, %c0_48] : memref<2x1x32xf32, #tpu.memory_space<vmem>>, vector<1x1x32xf32>
    %123 = vector.shape_cast %122 : vector<1x1x32xf32> to vector<1x32xf32>
    %cst_49 = arith.constant dense<0.000000e+00> : vector<16xf32>
    %124 = vector.multi_reduction <add>, %117, %cst_49 [1] : vector<16x32xf32> to vector<16xf32>
    %125 = vector.shape_cast %124 : vector<16xf32> to vector<16x1xf32>
    %cst_50 = arith.constant 3.200000e+01 : f32
    %126 = vector.broadcast %cst_50 : f32 to vector<16x1xf32>
    %127 = arith.divf %125, %126 : vector<16x1xf32>
    %128 = vector.broadcast %127 : vector<16x1xf32> to vector<16x32xf32>
    %129 = arith.subf %117, %128 : vector<16x32xf32>
    %130 = arith.mulf %129, %129 : vector<16x32xf32>
    %cst_51 = arith.constant dense<0.000000e+00> : vector<16xf32>
    %131 = vector.multi_reduction <add>, %130, %cst_51 [1] : vector<16x32xf32> to vector<16xf32>
    %132 = vector.shape_cast %131 : vector<16xf32> to vector<16x1xf32>
    %cst_52 = arith.constant 3.200000e+01 : f32
    %133 = vector.broadcast %cst_52 : f32 to vector<16x1xf32>
    %134 = arith.divf %132, %133 : vector<16x1xf32>
    %135 = vector.broadcast %127 : vector<16x1xf32> to vector<16x32xf32>
    %136 = arith.subf %117, %135 : vector<16x32xf32>
    %cst_53 = arith.constant 9.99999996E-13 : f32
    %137 = vector.broadcast %cst_53 : f32 to vector<16x1xf32>
    %138 = arith.addf %134, %137 : vector<16x1xf32>
    %139 = math.rsqrt %138 : vector<16x1xf32>
    %140 = vector.broadcast %139 : vector<16x1xf32> to vector<16x32xf32>
    %141 = arith.mulf %136, %140 : vector<16x32xf32>
    %142 = vector.broadcast %120 : vector<1x32xf32> to vector<16x32xf32>
    %143 = arith.mulf %141, %142 : vector<16x32xf32>
    %144 = vector.broadcast %123 : vector<1x32xf32> to vector<16x32xf32>
    %145 = arith.addf %143, %144 : vector<16x32xf32>
    %c0_54 = arith.constant 0 : index
    %c0_55 = arith.constant 0 : index
    %146 = vector.load %arg27[%c0_54, %c0_55] : memref<16x32xf32, #tpu.memory_space<vmem>>, vector<16x32xf32>
    tpu.vector_store %arg27[%c0_54, %c0_55], %145 {strides = array<i32>} : memref<16x32xf32, #tpu.memory_space<vmem>>, vector<16x32xf32>,
    %c1_i32 = arith.constant 1 : i32
    %147 = arith.cmpi eq, %arg0, %c1_i32 : i32
    %148 = arith.extui %147 : i1 to i32
    %c0_i32_56 = arith.constant 0 : i32
    %149 = arith.cmpi ne, %148, %c0_i32_56 : i32
    scf.if %149 {
      %c0_57 = arith.constant 0 : index
      %c0_58 = arith.constant 0 : index
      %150 = vector.load %arg5[%c0_57, %c0_58] : memref<2x16xf32, #tpu.memory_space<vmem>>, vector<2x16xf32>
      %cst_59 = arith.constant dense<0.000000e+00> : vector<2x32xf32>
      %151 = tpu.matmul %150, %145, %cst_59 {dimension_numbers = #tpu.dot_dimension_numbers<[1], [0], [0], [1], [0, 0, 1, 1], [], []>} : vector<2x16xf32>, vector<16x32xf32>, vector<2x32xf32> -> vector<2x32xf32>
      %c0_60 = arith.constant 0 : index
      %c0_61 = arith.constant 0 : index
      %152 = vector.load %arg20[%c0_60, %c0_61] : memref<32x32xf32, #tpu.memory_space<vmem>>, vector<32x32xf32>
      %153 = arith.truncf %151 : vector<2x32xf32> to vector<2x32xbf16>
      %154 = arith.truncf %152 : vector<32x32xf32> to vector<32x32xbf16>
      %cst_62 = arith.constant dense<0.000000e+00> : vector<2x32xf32>
      %155 = tpu.matmul %153, %154, %cst_62 {dimension_numbers = #tpu.dot_dimension_numbers<[1], [0], [0], [1], [0, 0, 1, 1], [], []>} : vector<2x32xbf16>, vector<32x32xbf16>, vector<2x32xf32> -> vector<2x32xf32>
      %c0_63 = arith.constant 0 : index
      %c0_64 = arith.constant 0 : index
      %156 = vector.load %arg21[%c0_63, %c0_64] : memref<1x32xf32, #tpu.memory_space<vmem>>, vector<1x32xf32>
      %157 = vector.broadcast %156 : vector<1x32xf32> to vector<2x32xf32>
      %158 = arith.addf %155, %157 : vector<2x32xf32>
      %159 = math.tanh %158 : vector<2x32xf32>
      %c0_65 = arith.constant 0 : index
      %c0_66 = arith.constant 0 : index
      %160 = vector.load %arg22[%c0_65, %c0_66] : memref<32x256xf32, #tpu.memory_space<vmem>>, vector<32x256xf32>
      %161 = arith.truncf %159 : vector<2x32xf32> to vector<2x32xbf16>
      %162 = arith.truncf %160 : vector<32x256xf32> to vector<32x256xbf16>
      %cst_67 = arith.constant dense<0.000000e+00> : vector<2x256xf32>
      %163 = tpu.matmul %161, %162, %cst_67 {dimension_numbers = #tpu.dot_dimension_numbers<[1], [0], [0], [1], [0, 0, 1, 1], [], []>} : vector<2x32xbf16>, vector<32x256xbf16>, vector<2x256xf32> -> vector<2x256xf32>
      %c0_68 = arith.constant 0 : index
      %c0_69 = arith.constant 0 : index
      %164 = vector.load %arg23[%c0_68, %c0_69] : memref<1x256xf32, #tpu.memory_space<vmem>>, vector<1x256xf32>
      %165 = vector.broadcast %164 : vector<1x256xf32> to vector<2x256xf32>
      %166 = arith.addf %163, %165 : vector<2x256xf32>
      %cst_70 = arith.constant 0.000000e+00 : f32
      %167 = vector.broadcast %cst_70 : f32 to vector<2x256xf32>
      %168 = arith.maximumf %166, %167 : vector<2x256xf32>
      %c0_71 = arith.constant 0 : index
      %c0_72 = arith.constant 0 : index
      %169 = vector.load %arg24[%c0_71, %c0_72] : memref<256x128xf32, #tpu.memory_space<vmem>>, vector<256x128xf32>
      %170 = arith.truncf %168 : vector<2x256xf32> to vector<2x256xbf16>
      %171 = arith.truncf %169 : vector<256x128xf32> to vector<256x128xbf16>
      %cst_73 = arith.constant dense<0.000000e+00> : vector<2x128xf32>
      %172 = tpu.matmul %170, %171, %cst_73 {dimension_numbers = #tpu.dot_dimension_numbers<[1], [0], [0], [1], [0, 0, 1, 1], [], []>} : vector<2x256xbf16>, vector<256x128xbf16>, vector<2x128xf32> -> vector<2x128xf32>
      %c0_74 = arith.constant 0 : index
      %c0_75 = arith.constant 0 : index
      %173 = vector.load %arg25[%c0_74, %c0_75] : memref<1x128xf32, #tpu.memory_space<vmem>>, vector<1x128xf32>
      %174 = vector.broadcast %173 : vector<1x128xf32> to vector<2x128xf32>
      %175 = arith.addf %172, %174 : vector<2x128xf32>
      %c0_76 = arith.constant 0 : index
      %c0_77 = arith.constant 0 : index
      %176 = vector.load %arg26[%c0_76, %c0_77] : memref<2x128xf32, #tpu.memory_space<vmem>>, vector<2x128xf32>
      tpu.vector_store %arg26[%c0_76, %c0_77], %175 {strides = array<i32>} : memref<2x128xf32, #tpu.memory_space<vmem>>, vector<2x128xf32>,
    } else {
    }
    return
  }
  func.func @transform_0(%arg0: i32) -> (i32, i32) {
    %c0_i32 = arith.constant 0 : i32
    %c0_i32_0 = arith.constant 0 : i32
    %c0_i32_1 = arith.constant 0 : i32
    return %c0_i32, %c0_i32_0 : i32, i32
  }
  func.func @transform_1(%arg0: i32) -> (i32, i32) {
    %c0_i32 = arith.constant 0 : i32
    %c0_i32_0 = arith.constant 0 : i32
    %c0_i32_1 = arith.constant 0 : i32
    return %c0_i32, %c0_i32_0 : i32, i32
  }
  func.func @transform_2(%arg0: i32) -> (i32, i32) {
    %c0_i32 = arith.constant 0 : i32
    %c0_i32_0 = arith.constant 0 : i32
    %c0_i32_1 = arith.constant 0 : i32
    return %c0_i32, %c0_i32_0 : i32, i32
  }
  func.func @transform_3(%arg0: i32) -> (i32, i32) {
    %c0_i32 = arith.constant 0 : i32
    %c0_i32_0 = arith.constant 0 : i32
    %c0_i32_1 = arith.constant 0 : i32
    return %c0_i32, %c0_i32_0 : i32, i32
  }
  func.func @transform_4(%arg0: i32) -> (i32, i32) {
    %c0_i32 = arith.constant 0 : i32
    %c0_i32_0 = arith.constant 0 : i32
    %c0_i32_1 = arith.constant 0 : i32
    return %c0_i32, %c0_i32_0 : i32, i32
  }
  func.func @transform_5(%arg0: i32) -> (i32, i32) {
    %c0_i32 = arith.constant 0 : i32
    %c0_i32_0 = arith.constant 0 : i32
    %c0_i32_1 = arith.constant 0 : i32
    return %c0_i32, %c0_i32_0 : i32, i32
  }
  func.func @transform_6(%arg0: i32) -> (i32, i32) {
    %c0_i32 = arith.constant 0 : i32
    %c0_i32_0 = arith.constant 0 : i32
    %c0_i32_1 = arith.constant 0 : i32
    return %c0_i32, %c0_i32_0 : i32, i32
  }
  func.func @transform_7(%arg0: i32) -> (i32, i32, i32) {
    %c0_i32 = arith.constant 0 : i32
    %c0_i32_0 = arith.constant 0 : i32
    %c0_i32_1 = arith.constant 0 : i32
    %c0_i32_2 = arith.constant 0 : i32
    return %c0_i32, %c0_i32_0, %c0_i32_1 : i32, i32, i32
  }
  func.func @transform_8(%arg0: i32) -> (i32, i32, i32) {
    %c0_i32 = arith.constant 0 : i32
    %c0_i32_0 = arith.constant 0 : i32
    %c0_i32_1 = arith.constant 0 : i32
    %c0_i32_2 = arith.constant 0 : i32
    return %c0_i32, %c0_i32_0, %c0_i32_1 : i32, i32, i32
  }
  func.func @transform_9(%arg0: i32) -> (i32, i32, i32) {
    %c0_i32 = arith.constant 0 : i32
    %c0_i32_0 = arith.constant 0 : i32
    %c0_i32_1 = arith.constant 0 : i32
    %c0_i32_2 = arith.constant 0 : i32
    return %c0_i32, %c0_i32_0, %c0_i32_1 : i32, i32, i32
  }
  func.func @transform_10(%arg0: i32) -> (i32, i32, i32) {
    %c0_i32 = arith.constant 0 : i32
    %c0_i32_0 = arith.constant 0 : i32
    %c0_i32_1 = arith.constant 0 : i32
    %c0_i32_2 = arith.constant 0 : i32
    return %c0_i32, %c0_i32_0, %c0_i32_1 : i32, i32, i32
  }
  func.func @transform_11(%arg0: i32) -> (i32, i32, i32) {
    %c0_i32 = arith.constant 0 : i32
    %c0_i32_0 = arith.constant 0 : i32
    %c0_i32_1 = arith.constant 0 : i32
    %c0_i32_2 = arith.constant 0 : i32
    return %c0_i32, %c0_i32_0, %c0_i32_1 : i32, i32, i32
  }
  func.func @transform_12(%arg0: i32) -> (i32, i32, i32) {
    %c0_i32 = arith.constant 0 : i32
    %c0_i32_0 = arith.constant 0 : i32
    %c0_i32_1 = arith.constant 0 : i32
    %c0_i32_2 = arith.constant 0 : i32
    return %c0_i32, %c0_i32_0, %c0_i32_1 : i32, i32, i32
  }
  func.func @transform_13(%arg0: i32) -> (i32, i32, i32) {
    %c0_i32 = arith.constant 0 : i32
    %c0_i32_0 = arith.constant 0 : i32
    %c0_i32_1 = arith.constant 0 : i32
    %c0_i32_2 = arith.constant 0 : i32
    return %c0_i32, %c0_i32_0, %c0_i32_1 : i32, i32, i32
  }
  func.func @transform_14(%arg0: i32) -> (i32, i32, i32) {
    %c0_i32 = arith.constant 0 : i32
    %c0_i32_0 = arith.constant 0 : i32
    %c0_i32_1 = arith.constant 0 : i32
    %c0_i32_2 = arith.constant 0 : i32
    return %c0_i32, %c0_i32_0, %c0_i32_1 : i32, i32, i32
  }
  func.func @transform_15(%arg0: i32) -> (i32, i32, i32) {
    %c0_i32 = arith.constant 0 : i32
    %c0_i32_0 = arith.constant 0 : i32
    %c0_i32_1 = arith.constant 0 : i32
    %c0_i32_2 = arith.constant 0 : i32
    return %c0_i32, %c0_i32_0, %c0_i32_1 : i32, i32, i32
  }
  func.func @transform_16(%arg0: i32) -> (i32, i32, i32) {
    %c0_i32 = arith.constant 0 : i32
    %c0_i32_0 = arith.constant 0 : i32
    %c0_i32_1 = arith.constant 0 : i32
    %c0_i32_2 = arith.constant 0 : i32
    return %c0_i32, %c0_i32_0, %c0_i32_1 : i32, i32, i32
  }
  func.func @transform_17(%arg0: i32) -> (i32, i32, i32) {
    %c0_i32 = arith.constant 0 : i32
    %c0_i32_0 = arith.constant 0 : i32
    %c0_i32_1 = arith.constant 0 : i32
    %c0_i32_2 = arith.constant 0 : i32
    return %c0_i32, %c0_i32_0, %c0_i32_1 : i32, i32, i32
  }
  func.func @transform_18(%arg0: i32) -> (i32, i32, i32) {
    %c0_i32 = arith.constant 0 : i32
    %c0_i32_0 = arith.constant 0 : i32
    %c0_i32_1 = arith.constant 0 : i32
    %c0_i32_2 = arith.constant 0 : i32
    return %c0_i32, %c0_i32_0, %c0_i32_1 : i32, i32, i32
  }
  func.func @transform_19(%arg0: i32) -> (i32, i32) {
    %c0_i32 = arith.constant 0 : i32
    %c0_i32_0 = arith.constant 0 : i32
    %c0_i32_1 = arith.constant 0 : i32
    return %c0_i32, %c0_i32_0 : i32, i32
  }
  func.func @transform_20(%arg0: i32) -> (i32, i32) {
    %c0_i32 = arith.constant 0 : i32
    %c0_i32_0 = arith.constant 0 : i32
    %c0_i32_1 = arith.constant 0 : i32
    return %c0_i32, %c0_i32_0 : i32, i32
  }
  func.func @transform_21(%arg0: i32) -> (i32, i32) {
    %c0_i32 = arith.constant 0 : i32
    %c0_i32_0 = arith.constant 0 : i32
    %c0_i32_1 = arith.constant 0 : i32
    return %c0_i32, %c0_i32_0 : i32, i32
  }
  func.func @transform_22(%arg0: i32) -> (i32, i32) {
    %c0_i32 = arith.constant 0 : i32
    %c0_i32_0 = arith.constant 0 : i32
    %c0_i32_1 = arith.constant 0 : i32
    return %c0_i32, %c0_i32_0 : i32, i32
  }
  func.func @transform_23(%arg0: i32) -> (i32, i32) {
    %c0_i32 = arith.constant 0 : i32
    %c0_i32_0 = arith.constant 0 : i32
    %c0_i32_1 = arith.constant 0 : i32
    return %c0_i32, %c0_i32_0 : i32, i32
  }
  func.func @transform_24(%arg0: i32) -> (i32, i32) {
    %c0_i32 = arith.constant 0 : i32
    %c0_i32_0 = arith.constant 0 : i32
    %c0_i32_1 = arith.constant 0 : i32
    return %c0_i32, %c0_i32_0 : i32, i32
  }
  func.func @transform_25(%arg0: i32) -> (i32, i32) {
    %c0_i32 = arith.constant 0 : i32
    %c0_i32_0 = arith.constant 0 : i32
    %c0_i32_1 = arith.constant 0 : i32
    return %c0_i32, %c0_i32_0 : i32, i32
  }
}

</mosaic_0001>

<bundles_post_ra>
// kernel: eq.36
= control target key start
LH: loop header
LB: loop body
LE: loop exit
PB: predicated region body
PF: predicated region fallthrough
CT: control target
= control target key end

     0   :  { %vm7_vm0 = vcmask 130048   ;;  %s37_s8 = smov 16   ;;  %s38_s9 = smov 32   ;;  %vm13_vm1 = vcmask 523648   ;;  %vm19_vm2 = vcmask 392448   ;;  %vm25_vm3 = vcmask 261248   ;;  %s55_s0 = inlined_call_operand.vmem [shape: s32[4,16], index: 0, kind: input, shape index: {}]   ;;  %s56_s1 = inlined_call_operand.vmem [shape: s32[64], index: 1, kind: output, shape index: {}]  }
   0x1   :  { %v4_v0 = vld [vmem:[%s55_s0] sm:$0xf]  ;;  %s36_s0 = smov 48  }
   0x2   :  { %5 = vst [vmem:[#allocation1] sm:$0xf] %v4_v0 }
   0x9   :  { %v10_v1 = vld [vmem:[#allocation1 + $0x3] sm:$0x1]   ;;  %v22_v2 = vld [vmem:[#allocation1 + $0x1] sm:$0x1]   ;;  %v6_v3 = vld [vmem:[#allocation1] sm:$0x1]  }
   0xa   :  { %11 = vrot.lane.b32.xlu0 %v10_v1, %s36_s0  ;;  %23 = vrot.lane.b32.xlu1 %v22_v2, %s37_s8  ;;  %v16_v4 = vld [vmem:[#allocation1 + $0x2] sm:$0x1]   ;;  %8 = vst.msk [vmem:[#allocation0] sm:$0x1] %vm7_vm0, %v6_v3  }
   0xe   :  { %17 = vrot.lane.b32.xlu0 %v16_v4, %s38_s9 }
  0x7c   :  { %v12_v5 = vpop.permute.xlu0 %11   ;;  %v24_v6 = vpop.permute.xlu1 %23  }
  0x7d   :  { %14 = vst.msk [vmem:[#allocation0] sm:$0x1] %vm13_vm1, %v12_v5  }
  0x80   :  { %v18_v7 = vpop.permute.xlu0 %17  }
  0x81   :  { %20 = vst.msk [vmem:[#allocation0] sm:$0x1] %vm19_vm2, %v18_v7  }
  0x82   :  { %26 = vst.msk [vmem:[#allocation0] sm:$0x1] %vm25_vm3, %v24_v6  }
  0x89   :  { %v30_v8 = vld [vmem:[#allocation0] sm:$0x1] }
  0x8a   :  { %32 = vst [vmem:[%s56_s1] sm:$0x1] %v30_v8 }

// kernel: tile.9
= control target key start
LH: loop header
LB: loop body
LE: loop exit
PB: predicated region body
PF: predicated region fallthrough
CT: control target
= control target key end

     0   :  { %vm82_vm0 = vcmask 1047556   ;;  %vm84_vm1 = vcmask 130048   ;;  %s195_s9 = smov 48   ;;  %s196_s14 = smov 16   ;;  %vm103_vm2 = vcmask 523648   ;;  %vm124_vm3 = vcmask 392448   ;;  %s289_s0 = inlined_call_operand.vmem [shape: f32[16,4,16], index: 0, kind: input, shape index: {}]   ;;  %s290_s1 = inlined_call_operand.vmem [shape: f32[16,64], index: 1, kind: output, shape index: {}]  }
   0x1   :  { %v180_v0 = vld [vmem:[%s289_s0 + $0x1c] sm:$0xf]  ;;  %v181_v1 = vld [vmem:[%s289_s0 + $0x18] sm:$0xf]  ;;  %v182_v2 = vld [vmem:[%s289_s0 + $0x14] sm:$0xf] }
   0x2   :  { %48 = vst [vmem:[#allocation0 + $0x38] sm:$0xf] %v180_v0  ;;  %53 = vst [vmem:[#allocation0 + $0x30] sm:$0xf] %v181_v1  ;;  %v183_v3 = vld [vmem:[%s289_s0 + $0x10] sm:$0xf] }
   0x3   :  { %58 = vst [vmem:[#allocation0 + $0x28] sm:$0xf] %v182_v2  ;;  %v184_v4 = vld [vmem:[%s289_s0 + $0xc] sm:$0xf]  ;;  %v185_v5 = vld [vmem:[%s289_s0 + $0x8] sm:$0xf] }
   0x4   :  { %63 = vst [vmem:[#allocation0 + $0x20] sm:$0xf] %v183_v3  ;;  %68 = vst [vmem:[#allocation0 + $0x18] sm:$0xf] %v184_v4  ;;  %v186_v6 = vld [vmem:[%s289_s0 + $0x4] sm:$0xf] }
   0x5   :  { %73 = vst [vmem:[#allocation0 + $0x10] sm:$0xf] %v185_v5  ;;  %v78_v7 = vld [vmem:[%s289_s0] sm:$0xf]  ;;  %77 = vst [vmem:[#allocation0 + $0x8] sm:$0xf] %v186_v6 }
   0x6   :  { %79 = vst [vmem:[#allocation0] sm:$0xf] %v78_v7  ;;  %v172_v8 = vld [vmem:[%s289_s0 + $0x3c] sm:$0xf]  ;;  %v173_v9 = vld [vmem:[%s289_s0 + $0x38] sm:$0xf] }
   0x7   :  { %8 = vst [vmem:[#allocation0 + $0x78] sm:$0xf] %v172_v8  ;;  %13 = vst [vmem:[#allocation0 + $0x70] sm:$0xf] %v173_v9  ;;  %v174_v10 = vld [vmem:[%s289_s0 + $0x34] sm:$0xf] }
   0x8   :  { %v175_v11 = vld [vmem:[%s289_s0 + $0x30] sm:$0xf]  ;;  %v176_v12 = vld [vmem:[%s289_s0 + $0x2c] sm:$0xf]  ;;  %18 = vst [vmem:[#allocation0 + $0x68] sm:$0xf] %v174_v10 }
   0x9   :  { %23 = vst [vmem:[#allocation0 + $0x60] sm:$0xf] %v175_v11  ;;  %28 = vst [vmem:[#allocation0 + $0x58] sm:$0xf] %v176_v12  ;;  %v177_v13 = vld [vmem:[%s289_s0 + $0x28] sm:$0xf] }
   0xa   :  { %v178_v14 = vld [vmem:[%s289_s0 + $0x24] sm:$0xf]  ;;  %v179_v15 = vld [vmem:[%s289_s0 + $0x20] sm:$0xf]  ;;  %33 = vst [vmem:[#allocation0 + $0x50] sm:$0xf] %v177_v13 }
   0xb   :  { %38 = vst [vmem:[#allocation0 + $0x48] sm:$0xf] %v178_v14  ;;  %43 = vst [vmem:[#allocation0 + $0x40] sm:$0xf] %v179_v15  ;;  %s194_s0 = smov 32   ;;  %vm145_vm4 = vcmask 261248  }
   0xc   :  { %v119_v16 = vld [vmem:[#allocation0 + $0x2] ss:$8 sm:$0xf0]   ;;  %v98_v17 = vld [vmem:[#allocation0 + $0x3] ss:$8 sm:$0xf0]  }
   0xd   :  { %v117_v18 = vld [vmem:[#allocation0 + $0x2] ss:$8 sm:$0xf]   ;;  %v96_v19 = vld [vmem:[#allocation0 + $0x3] ss:$8 sm:$0xf]  }
   0xe   :  { %v121_v20 = vsel %vm82_vm0, %v119_v16, %v117_v18  ;;  %v100_v21 = vsel %vm82_vm0, %v98_v17, %v96_v19  ;;  %v138_v24 = vld [vmem:[#allocation0 + $0x1] ss:$8 sm:$0xf]   ;;  %v80_v32 = vld [vmem:[#allocation0] ss:$8 sm:$0xf]  }
   0xf   :  { %122 = vrot.lane.b32.xlu1 %v121_v20, %s194_s0  ;;  %101 = vrot.lane.b32.xlu0 %v100_v21, %s195_s9  ;;  %v140_v25 = vld [vmem:[#allocation0 + $0x1] ss:$8 sm:$0xf0]   ;;  %v81_v33 = vld [vmem:[#allocation0] ss:$8 sm:$0xf0]  }
  0x10   :  { %v129_v22 = vld [vmem:[#allocation0 + $0x42] ss:$8 sm:$0xf0]   ;;  %v108_v23 = vld [vmem:[#allocation0 + $0x43] ss:$8 sm:$0xf0]   ;;  %v83_v34 = vsel %vm82_vm0, %v81_v33, %v80_v32  ;;  %v142_v38 = vsel %vm82_vm0, %v140_v25, %v138_v24 }
  0x11   :  { %v150_v31 = vld [vmem:[#allocation0 + $0x41] ss:$8 sm:$0xf0]   ;;  %v89_v36 = vld [vmem:[#allocation0 + $0x40] ss:$8 sm:$0xf0]  }
  0x12   :  { %v127_v26 = vld [vmem:[#allocation0 + $0x42] ss:$8 sm:$0xf]   ;;  %v106_v27 = vld [vmem:[#allocation0 + $0x43] ss:$8 sm:$0xf]  }
  0x13   :  { %v131_v28 = vsel %vm82_vm0, %v129_v22, %v127_v26  ;;  %v110_v29 = vsel %vm82_vm0, %v108_v23, %v106_v27  ;;  %v148_v30 = vld [vmem:[#allocation0 + $0x41] ss:$8 sm:$0xf]   ;;  %v87_v35 = vld [vmem:[#allocation0 + $0x40] ss:$8 sm:$0xf]  }
  0x14   :  { %132 = vrot.lane.b32.xlu1 %v131_v28, %s194_s0  ;;  %111 = vrot.lane.b32.xlu0 %v110_v29, %s195_s9  ;;  %v152_v37 = vsel %vm82_vm0, %v150_v31, %v148_v30  ;;  %85 = vst.msk [vmem:[%s290_s1] sm:$0xff] %vm84_vm1, %v83_v34   ;;  %v91_v39 = vsel %vm82_vm0, %v89_v36, %v87_v35 }
  0x15   :  { %187 = vst.msk [vmem:[%s290_s1 + $0x8] sm:$0xff] %vm84_vm1, %v91_v39  }
  0x18   :  { %153 = vrot.lane.b32.xlu1 %v152_v37, %s196_s14  ;;  %143 = vrot.lane.b32.xlu0 %v142_v38, %s196_s14 }
  0x81   :  { %v123_v40 = vpop.permute.xlu1 %122   ;;  %v102_v41 = vpop.permute.xlu0 %101  }
  0x82   :  { %104 = vst.msk [vmem:[%s290_s1] sm:$0xff] %vm103_vm2, %v102_v41  }
  0x83   :  { %125 = vst.msk [vmem:[%s290_s1] sm:$0xff] %vm124_vm3, %v123_v40  }
  0x86   :  { %v133_v42 = vpop.permute.xlu1 %132   ;;  %v112_v43 = vpop.permute.xlu0 %111  }
  0x87   :  { %188 = vst.msk [vmem:[%s290_s1 + $0x8] sm:$0xff] %vm103_vm2, %v112_v43  }
  0x88   :  { %189 = vst.msk [vmem:[%s290_s1 + $0x8] sm:$0xff] %vm124_vm3, %v133_v42  }
  0x8a   :  { %v154_v44 = vpop.permute.xlu1 %153   ;;  %v144_v45 = vpop.permute.xlu0 %143  }
  0x8b   :  { %190 = vst.msk [vmem:[%s290_s1 + $0x8] sm:$0xff] %vm145_vm4, %v154_v44   ;;  %146 = vst.msk [vmem:[%s290_s1] sm:$0xff] %vm145_vm4, %v144_v45  }

// kernel: bert_classifier_forward.1
= control target key start
LH: loop header
LB: loop body
LE: loop exit
PB: predicated region body
PF: predicated region fallthrough
CT: control target
= control target key end

     0   :  { %s2737_s0 = inlined_call_operand.vmem [shape: f32[16,32], index: 0, kind: input, shape index: {}]   ;;  %s2738_s1 = inlined_call_operand.vmem [shape: f32[16,64], index: 1, kind: input, shape index: {}]   ;;  %s2739_s2 = inlined_call_operand.vmem [shape: f32[64,32], index: 2, kind: input, shape index: {}]   ;;  %s2740_s3 = inlined_call_operand.vmem [shape: f32[64,64], index: 3, kind: input, shape index: {}]   ;;  %s2741_s4 = inlined_call_operand.vmem [shape: f32[2,16], index: 4, kind: input, shape index: {}]   ;;  %s2742_s5 = inlined_call_operand.vmem [shape: f32[1,32], index: 5, kind: input, shape index: {}]   ;;  %s2743_s6 = inlined_call_operand.vmem [shape: f32[1,32], index: 6, kind: input, shape index: {}]   ;;  %s2744_s7 = inlined_call_operand.vmem [shape: f32[2,32,96], index: 7, kind: input, shape index: {}]   ;;  %s2745_s8 = inlined_call_operand.vmem [shape: f32[2,1,96], index: 8, kind: input, shape index: {}]   ;;  %s2746_s9 = inlined_call_operand.vmem [shape: f32[2,32,32], index: 9, kind: input, shape index: {}]   ;;  %s2747_s10 = inlined_call_operand.vmem [shape: f32[2,1,32], index: 10, kind: input, shape index: {}]   ;;  %s2748_s11 = inlined_call_operand.vmem [shape: f32[2,1,32], index: 11, kind: input, shape index: {}]   ;;  %s2749_s12 = inlined_call_operand.vmem [shape: f32[2,1,32], index: 12, kind: input, shape index: {}]   ;;  %s2750_s13 = inlined_call_operand.vmem [shape: f32[2,32,64], index: 13, kind: input, shape index: {}]   ;;  %s2751_s14 = inlined_call_operand.vmem [shape: f32[2,1,64], index: 14, kind: input, shape index: {}]   ;;  %s2752_s15 = inlined_call_operand.vmem [shape: f32[2,64,32], index: 15, kind: input, shape index: {}]   ;;  %s2753_s16 = inlined_call_operand.vmem [shape: f32[2,1,32], index: 16, kind: input, shape index: {}]   ;;  %s2754_s17 = inlined_call_operand.vmem [shape: f32[2,1,32], index: 17, kind: input, shape index: {}]   ;;  %s2755_s18 = inlined_call_operand.vmem [shape: f32[2,1,32], index: 18, kind: input, shape index: {}]   ;;  %s2756_s19 = inlined_call_operand.vmem [shape: f32[32,32], index: 19, kind: input, shape index: {}]   ;;  %s2757_s20 = inlined_call_operand.vmem [shape: f32[1,32], index: 20, kind: input, shape index: {}]   ;;  %s2758_s21 = inlined_call_operand.vmem [shape: f32[32,256], index: 21, kind: input, shape index: {}]   ;;  %s2759_s22 = inlined_call_operand.vmem [shape: f32[1,256], index: 22, kind: input, shape index: {}]   ;;  %s2760_s23 = inlined_call_operand.vmem [shape: f32[256,128], index: 23, kind: input, shape index: {}]   ;;  %s2761_s24 = inlined_call_operand.vmem [shape: f32[1,128], index: 24, kind: input, shape index: {}]   ;;  %s2762_s25 = inlined_call_operand.hbm [shape: f32[2,128], index: 25, kind: output, shape index: {}]  }
   0x1   :  { %2769 = sst [smem:[#allocation6_spill]] %s2737_s0 }
   0x2   :  { %2770 = sst [smem:[#allocation7_spill]] %s2738_s1 }
   0x3   :  { %2771 = sst [smem:[#allocation8_spill]] %s2739_s2 }
   0x4   :  { %2772 = sst [smem:[#allocation9_spill]] %s2740_s3 }
   0x5   :  { %2773 = sst [smem:[#allocation10_spill]] %s2741_s4 }
   0x6   :  { %2774 = sst [smem:[#allocation11_spill]] %s2742_s5 }
   0x7   :  { %2775 = sst [smem:[#allocation12_spill]] %s2743_s6 }
   0x8   :  { %2776 = sst [smem:[#allocation13_spill]] %s2744_s7 }
   0x9   :  { %2777 = sst [smem:[#allocation14_spill]] %s2745_s8 }
   0xa   :  { %2778 = sst [smem:[#allocation15_spill]] %s2746_s9 }
   0xb   :  { %30 = vsyncpa [#allocation4], 0  ;;  %s2319_s29 = smov 0  }
   0xc LB: > { %s2325_s2 = sadd.s32 4294967295, %s2177_s29   ;;  %p1874_p0 = scmp.ge.s32.totalorder %s2177_s29, 1  ;;  %s2177_s29 = sphi %s2319_s29, %s36_s29  }
   0xd   : > { %p673_p1 = scmp.lt.s32.totalorder %s2177_s29, 3 }
   0xf   : > { %p674_p2 = pnand %p1874_p0, %p673_p1 }
  0x10   : > { %p1875_p3 = scmp.ne.s32.totalorder (!%p674_p2), %s2325_s2, 0 }
  0x11   : > { %677 = sbr.rel (%p674_p2) target bundleno = 3568 (0xdf0), region = 120 }
  0x18   : > { %735 = sbr.rel (%p1875_p3) target bundleno = 349 (0x15d), region = 124  ;;  %s2779_s7 = sld [smem:[#allocation6_spill]] (!%p1875_p3)  ;;  %vm740_vm0 = vcmask (!%p1875_p3), 261120  }
  0x19   : > { %s2780_s27 = sld [smem:[#allocation11_spill]] (!%p1875_p3)  ;;  %s2781_s9 = sld [smem:[#allocation12_spill]] (!%p1875_p3) }
  0x1e   : > { %v736_v0 = vld [vmem:[%s2779_s7] sm:$0xff] (!%p1875_p3)  ;;  %v737_v1 = vld [vmem:[%s2779_s7 + $0x8] sm:$0xff] (!%p1875_p3) }
  0x1f   : > { %v741_v2 = vsel %vm740_vm0, %v736_v0, 0.0  ;;  %v744_v3 = vsel %vm740_vm0, %v737_v1, 0.0  ;;  %v1876_v21 = vld [vmem:[%s2780_s27] ss:$0 sm:$0xff] }
  0x20   : > { %742 = vadd.xlane.f32.xlu0 %v741_v2  ;;  %v1877_v23 = vld [vmem:[%s2781_s9] ss:$0 sm:$0xff] }
  0x24   : > { %745 = vadd.xlane.f32.xlu0 %v744_v3 }
  0xad   : > { %v743_v4 = vpop.xlane.xlu0 %742 }
  0xae   : > { %v748_v5 = vmul.f32 0.03125, %v743_v4 }
  0xb0   : > { %v750_v6 = vsub.f32 %v736_v0, %v748_v5 }
  0xb1   : > { %v746_v7 = vpop.xlane.xlu0 %745 }
  0xb2   : > { %v749_v8 = vmul.f32 0.03125, %v746_v7  ;;  %v752_v9 = vmul.f32 %v750_v6, %v750_v6 }
  0xb4   : > { %v751_v10 = vsub.f32 %v737_v1, %v749_v8  ;;  %v754_v11 = vsel %vm740_vm0, %v752_v9, 0.0 }
  0xb5   : > { %755 = vadd.xlane.f32.xlu1 %v754_v11 }
  0xb6   : > { %v753_v12 = vmul.f32 %v751_v10, %v751_v10 }
  0xb8   : > { %v757_v13 = vsel %vm740_vm0, %v753_v12, 0.0 }
  0xb9   : > { %758 = vadd.xlane.f32.xlu1 %v757_v13 }
 0x142   : > { %v756_v14 = vpop.xlane.xlu1 %755 }
 0x143   : > { %v760_v15 = vmul.f32 0.03125, %v756_v14 }
 0x145   : > { %v762_v16 = vadd.f32 1e-12, %v760_v15 }
 0x146   : > { %v759_v17 = vpop.xlane.xlu1 %758 }
 0x147   : > { %2115 = vrsqrt.f32 %v762_v16  ;;  %v761_v18 = vmul.f32 0.03125, %v759_v17 }
 0x149   : > { %v763_v19 = vadd.f32 1e-12, %v761_v18 }
 0x14b   : > { %2117 = vrsqrt.f32 %v763_v19 }
 0x151   : > { %v2116_v20 = vpop.eup %2115 }
 0x152   : > { %v766_v22 = vmul.f32 %v2116_v20, %v750_v6 }
 0x154   : > { %v774_v24 = vmul.f32 %v1876_v21, %v766_v22 }
 0x155   : > { %v2118_v25 = vpop.eup %2117 }
 0x156   : > { %v782_v26 = vadd.f32 %v1877_v23, %v774_v24  ;;  %v767_v27 = vmul.f32 %v2118_v25, %v751_v10 }
 0x158   : > { %784 = vst.msk [vmem:[#allocation2] sm:$0xff] %vm740_vm0, %v782_v26  ;;  %v775_v28 = vmul.f32 %v1876_v21, %v767_v27 }
 0x15a   : > { %v783_v29 = vadd.f32 %v1877_v23, %v775_v28 }
 0x15c   : > { %785 = vst.msk [vmem:[#allocation2 + $0x8] sm:$0xff] %vm740_vm0, %v783_v29 }
 0x15d PF: > { %s2349_s5 = sshll.u32 %s2325_s2, 5  ;;  %v2179_v30 = vmov 0.0   ;;  %s2782_s30 = sld [smem:[#allocation13_spill]]  ;;  %vm2180_vm1 = vmmov 0   ;;  %vm805_vm2 = vcmask 261120   ;;  %vm977_vm3 = vcmask 523264  }
 0x15e   : > { %1974 = vmatprep.subr.bf16.mxu0 %v2179_v30  ;;  %1978 = vmatprep.mubr.msk.bf16.mxu0 %vm2180_vm1, %v2179_v30  ;;  %s2783_s8 = sld [smem:[#allocation8_spill]]  ;;  %s2181_s28 = smov 32  }
 0x15f   : > { %1982 = vmatprep.subr.bf16.mxu1 %v2179_v30  ;;  %1990 = vmatprep.mubr.msk.bf16.mxu1 %vm2180_vm1, %v2179_v30  ;;  %v2379_v41 = vld [vmem:[#allocation2] sm:$0xff]  ;;  %s2784_s26 = sld [smem:[#allocation14_spill]]  ;;  %s2183_s27 = smov 64  }
 0x160   : > { %s2785_s0 = sld [smem:[#allocation7_spill]]  ;;  %s1220_s6 = scalar_lea.vmem %s2747_s10, %s2325_s2 }
 0x161   : > { %s2787_s4 = sld [smem:[#allocation15_spill]]  ;;  %p1899_p4 = scmp.ne.s32.totalorder %s2325_s2, 1 }
 0x162   : > { %vm2185_vm4 = vmmov (!%p1899_p4), 0   ;;  %vm1521_vm5 = vcmask (!%p1899_p4), 130048  }
 0x163   : > { %s789_s3 = scalar_lea.vmem %s2782_s30, %s2349_s5  ;;  %v2381_v42 = vld [vmem:[#allocation2 + $0x8] sm:$0xff] }
 0x164   : > { %v2361_v31 = vld [vmem:[%s2783_s8] sm:$0xff]  ;;  %v2366_v32 = vld [vmem:[%s2783_s8 + $0x10] sm:$0xff]  ;;  %v791_v34 = vld [vmem:[%s789_s3 + $0x8] sm:$0xff]  ;;  %v794_v43 = vpack.c.bf16 %v2381_v42, %v2379_v41 }
 0x165   : > { %v790_v33 = vld [vmem:[%s789_s3] sm:$0xff]  ;;  %v792_v35 = vld [vmem:[%s789_s3 + $0x10] sm:$0xff]  ;;  %v793_v37 = vld [vmem:[%s789_s3 + $0x18] sm:$0xff]  ;;  %866 = vrot.lane.b32.xlu0 %v2361_v31, %s2181_s28  ;;  %s797_s1 = scalar_lea.vmem %s2784_s26, %s2325_s2  ;;  %s1321_s26 = scalar_lea.vmem %s2750_s13, %s2349_s5 }
 0x166   : > { %v795_v36 = vpack.c.bf16 %v791_v34, %v790_v33  ;;  %870 = vrot.lane.b32.xlu1 %v2366_v32, %s2181_s28  ;;  %v851_v38 = vld [vmem:[%s2783_s8 + $0x8] sm:$0xff]  ;;  %v853_v39 = vld [vmem:[%s2783_s8 + $0x18] sm:$0xff]  ;;  %v796_v40 = vpack.c.bf16 %v793_v37, %v792_v35  ;;  %v854_v44 = vld [vmem:[%s2783_s8 + $0x20] sm:$0xff]  ;;  %s1468_s3 = scalar_lea.vmem %s2754_s17, %s2325_s2 }
 0x167   : > { %v855_v45 = vld [vmem:[%s2783_s8 + $0x28] sm:$0xff]  ;;  %v856_v46 = vld [vmem:[%s2783_s8 + $0x30] sm:$0xff]  ;;  %v857_v47 = vld [vmem:[%s2783_s8 + $0x38] sm:$0xff]  ;;  %s1115_s9 = scalar_lea.vmem %s2787_s4, %s2349_s5  ;;  %s1274_s4 = scalar_lea.vmem %s2748_s11, %s2325_s2 }
 0x168   : > { %1975 = vmatpush3.bf16.msra.mxu0 %v795_v36  ;;  %v1879_v53 = vld [vmem:[%s797_s1] ss:$0 sm:$0xff]  ;;  %v974_v27 = vld [vmem:[%s2785_s0 + $0x8] sm:$0xff]  ;;  %s2786_s1 = sld [smem:[#allocation9_spill]] }
 0x169   : > { %1976 = vmatprep.subr.bf16.mxu0 %v2179_v30  ;;  %868 = vrot.lane.b32.xlu0 %v851_v38, %s2181_s28  ;;  %v973_v21 = vld [vmem:[%s2785_s0] sm:$0xff]  ;;  %s1276_s0 = scalar_lea.vmem %s2749_s12, %s2325_s2 }
 0x16a   : > { %872 = vrot.lane.b32.xlu1 %v853_v39, %s2181_s28 }
 0x16c   : > { %1977 = vmatpush3.bf16.msra.mxu0 %v796_v40 }
 0x16d   : > { %874 = vrot.lane.b32.xlu0 %v854_v44, %s2181_s28 }
 0x16e   : > { %876 = vrot.lane.b32.xlu1 %v855_v45, %s2181_s28  ;;  %v991_v40 = vld [vmem:[%s2786_s1 + $0x8] sm:$0xff] }
 0x16f   : > { %1979 = vmatmul.mubr.msk.bf16.vlgmr.msra.gmra.mrb[0].mxu0 %vm805_vm2, %v794_v43 }
 0x171   : > { %878 = vrot.lane.b32.xlu0 %v856_v46, %s2181_s28 }
 0x172   : > { %880 = vrot.lane.b32.xlu1 %v857_v47, %s2181_s28  ;;  %s2182_s28 = smov 96  }
 0x1d7   : > { %v867_v49 = vpop.permute.xlu0 %866 }
 0x1d8   : > { %v871_v48 = vpop.permute.xlu1 %870 }
 0x1db   : > { %v869_v51 = vpop.permute.xlu0 %868 }
 0x1dc   : > { %v873_v50 = vpop.permute.xlu1 %872 }
 0x1df   : > { %v875_v54 = vpop.permute.xlu0 %874 }
 0x1e0   : > { %v877_v52 = vpop.permute.xlu1 %876 }
 0x1e3   : > { %v879_v2 = vpop.permute.xlu0 %878 }
 0x1e4   : > { %v881_v61 = vpop.permute.xlu1 %880 }
 0x242   : > { %v843_v55 = vpop.f32.mrb[0].mxu0 }
 0x243   : > { %v2403_v56 = vadd.f32 %v1879_v53, %v843_v55  ;;  %v1980_v57 = vpop.f32.mrb[1].mxu0 }
 0x244   : > { %v846_v58 = vpop.f32.mrb[2].mxu0 }
 0x245   : > { %v2405_v59 = vadd.f32 %v1879_v53, %v846_v58  ;;  %v1981_v60 = vpop.f32.mrb[3].mxu0  ;;  %v892_v62 = vmul.f32 %v871_v48, %v2403_v56  ;;  %v890_v0 = vmul.f32 %v867_v49, %v2403_v56  ;;  %v896_v7 = vmul.f32 %v879_v2, %v2403_v56 }
 0x246   : > { %v894_v8 = vmul.f32 %v875_v54, %v2403_v56 }
 0x247   : > { %v893_v63 = vmul.f32 %v873_v50, %v2405_v59  ;;  %v891_v1 = vmul.f32 %v869_v51, %v2405_v59  ;;  %v897_v3 = vmul.f32 %v881_v61, %v2405_v59  ;;  %v895_v6 = vmul.f32 %v877_v52, %v2405_v59  ;;  %v992_v50 = vld [vmem:[%s2786_s1 + $0x10] sm:$0xff]  ;;  %v993_v51 = vld [vmem:[%s2786_s1 + $0x18] sm:$0xff]  ;;  %v994_v61 = vld [vmem:[%s2786_s1 + $0x20] sm:$0xff] }
 0x248   : > { %v898_v19 = vpack.c.bf16 %v2405_v59, %v2403_v56  ;;  %v2076_v55 = vpack.c.bf16 %v993_v51, %v992_v50 }
 0x249   : > { %v900_v4 = vpack.c.bf16 %v893_v63, %v892_v62  ;;  %v899_v5 = vpack.c.bf16 %v891_v1, %v890_v0  ;;  %v902_v9 = vpack.c.bf16 %v897_v3, %v896_v7  ;;  %v901_v10 = vpack.c.bf16 %v895_v6, %v894_v8  ;;  %v995_v62 = vld [vmem:[%s2786_s1 + $0x28] sm:$0xff]  ;;  %v1116_v3 = vld [vmem:[%s1115_s9] sm:$0xff] }
 0x24a   : > { %v2080_v0 = vpack.c.bf16 %v995_v62, %v994_v61 }
 0x24b   : > { %909 = vrot.lane.b32.xlu1 %v900_v4, %s2182_s28  ;;  %907 = vrot.lane.b32.xlu0 %v899_v5, %s2182_s28  ;;  %v1117_v4 = vld [vmem:[%s1115_s9 + $0x8] sm:$0xff] }
 0x24c   : > { %v1124_v5 = vpack.c.bf16 %v1117_v4, %v1116_v3 }
 0x24f   : > { %913 = vrot.lane.b32.xlu1 %v902_v9, %s2182_s28  ;;  %911 = vrot.lane.b32.xlu0 %v901_v10, %s2182_s28  ;;  %s1470_s28 = scalar_lea.vmem %s2755_s18, %s2325_s2 }
 0x253   : > { %1085 = vrot.lane.b32.xlu1 %v851_v38, %s2183_s27  ;;  %1083 = vrot.lane.b32.xlu0 %v2361_v31, %s2183_s27 }
 0x257   : > { %1089 = vrot.lane.b32.xlu1 %v853_v39, %s2183_s27  ;;  %1087 = vrot.lane.b32.xlu0 %v2366_v32, %s2183_s27  ;;  %v990_v39 = vld [vmem:[%s2786_s1] sm:$0xff] }
 0x25b   : > { %1093 = vrot.lane.b32.xlu1 %v855_v45, %s2183_s27  ;;  %1091 = vrot.lane.b32.xlu0 %v854_v44, %s2183_s27  ;;  %v2072_v45 = vpack.c.bf16 %v991_v40, %v990_v39 }
 0x25d   : > { %2073 = vmatprep.subr.bf16.mxu0 %v2072_v45 }
 0x25e   : > { %2075 = vmatpush3.bf16.msra.mxu0 %v2072_v45 }
 0x25f   : > { %1097 = vrot.lane.b32.xlu1 %v857_v47, %s2183_s27  ;;  %1095 = vrot.lane.b32.xlu0 %v856_v46, %s2183_s27 }
 0x260   : > { %2077 = vmatprep.subr.bf16.mxu0 %v2076_v55 }
 0x262   : > { %2079 = vmatpush3.bf16.msra.mxu0 %v2076_v55 }
 0x263   : > { %2081 = vmatprep.subr.bf16.mxu0 %v2080_v0 }
 0x266   : > { %2083 = vmatpush3.bf16.msra.mxu0 %v2080_v0 }
 0x2bd   : > { %v908_v11 = vpop.permute.xlu0 %907  ;;  %v910_v13 = vpop.permute.xlu1 %909 }
 0x2be   : > { %v919_v12 = vsel %vm805_vm2, %v908_v11, 0  ;;  %v922_v14 = vsel %vm805_vm2, %v910_v13, 0  ;;  %v1119_v13 = vld [vmem:[%s1115_s9 + $0x18] sm:$0xff] }
 0x2bf   : > { %1983 = vmatpush3.bf16.xpose.msra.mxu1 %v919_v12  ;;  %v1118_v12 = vld [vmem:[%s1115_s9 + $0x10] sm:$0xff] }
 0x2c0   : > { %1984 = vmatprep.subr.bf16.mxu1 %v2179_v30 }
 0x2c1   : > { %v912_v15 = vpop.permute.xlu0 %911  ;;  %v914_v17 = vpop.permute.xlu1 %913 }
 0x2c2   : > { %v925_v16 = vsel %vm805_vm2, %v912_v15, 0  ;;  %v928_v18 = vsel %vm805_vm2, %v914_v17, 0  ;;  %v1125_v15 = vpack.c.bf16 %v1119_v13, %v1118_v12  ;;  %v1890_v12 = vld [vmem:[%s1274_s4] ss:$0 sm:$0xff]  ;;  %s1329_s4 = scalar_lea.vmem %s2751_s14, %s2325_s2 }
 0x2c5   : > { %v1086_v22 = vpop.permute.xlu1 %1085  ;;  %v1084_v25 = vpop.permute.xlu0 %1083 }
 0x2c6   : > { %v1108_v48 = vmul.f32 %v1086_v22, %v2405_v59  ;;  %v1107_v49 = vmul.f32 %v1084_v25, %v2403_v56 }
 0x2c7   : > { %1985 = vmatpush3.bf16.xpose.msra.mxu1 %v922_v14 }
 0x2c8   : > { %1986 = vmatprep.subr.bf16.mxu1 %v2179_v30  ;;  %v1120_v57 = vpack.c.bf16 %v1108_v48, %v1107_v49 }
 0x2c9   : > { %v1090_v35 = vpop.permute.xlu1 %1089  ;;  %v1088_v36 = vpop.permute.xlu0 %1087 }
 0x2ca   : > { %v1110_v43 = vmul.f32 %v1090_v35, %v2405_v59  ;;  %v1109_v44 = vmul.f32 %v1088_v36, %v2403_v56 }
 0x2cc   : > { %v1121_v52 = vpack.c.bf16 %v1110_v43, %v1109_v44  ;;  %v1888_v43 = vld [vmem:[%s1220_s6] ss:$0 sm:$0xff]  ;;  %s1894_s6 = sshll.u32 %s2325_s2, 6 }
 0x2cd   : > { %v1094_v37 = vpop.permute.xlu1 %1093  ;;  %v1092_v38 = vpop.permute.xlu0 %1091 }
 0x2ce   : > { %v1112_v58 = vmul.f32 %v1094_v37, %v2405_v59  ;;  %v1111_v60 = vmul.f32 %v1092_v38, %v2403_v56 }
 0x2cf   : > { %1987 = vmatpush3.bf16.xpose.msra.mxu1 %v925_v16 }
 0x2d0   : > { %1988 = vmatprep.subr.bf16.mxu1 %v2179_v30  ;;  %v1122_v1 = vpack.c.bf16 %v1112_v58, %v1111_v60 }
 0x2d1   : > { %v1098_v46 = vpop.permute.xlu1 %1097  ;;  %v1096_v47 = vpop.permute.xlu0 %1095 }
 0x2d2   : > { %v1114_v53 = vmul.f32 %v1098_v46, %v2405_v59  ;;  %v1113_v54 = vmul.f32 %v1096_v47, %v2403_v56  ;;  %v996_v56 = vld [vmem:[%s2786_s1 + $0x30] sm:$0xff]  ;;  %v997_v59 = vld [vmem:[%s2786_s1 + $0x38] sm:$0xff] }
 0x2d3   : > { %v2084_v2 = vpack.c.bf16 %v997_v59, %v996_v56  ;;  %v1323_v56 = vld [vmem:[%s1321_s26 + $0x8] sm:$0xff] }
 0x2d4   : > { %v1123_v63 = vpack.c.bf16 %v1114_v53, %v1113_v54 }
 0x2d5   : > { %2085 = vmatprep.subr.bf16.mxu0 %v2084_v2 }
 0x2d6   : > { %2087 = vmatpush3.bf16.msra.mxu0 %v2084_v2  ;;  %v1325_v2 = vld [vmem:[%s1321_s26 + $0x18] sm:$0xff] }
 0x2d7   : > { %1989 = vmatpush3.bf16.xpose.msra.mxu1 %v928_v18  ;;  %2013 = vmatprep.subr.bf16.mxu0 %v1124_v5 }
 0x2d8   : > { %2037 = vmatprep.subr.bf16.mxu1 %v2179_v30 }
 0x2de   : > { %1991 = vmatmul.mubr.msk.bf16.vlgmr.msra.gmra.mrb[0].mxu1 %vm805_vm2, %v898_v19 }
 0x2df   : > { %2041 = vmatprep.mubr.msk.bf16.mxu1 %vm2180_vm1, %v2179_v30 }
 0x3b1   : > { %v964_v20 = vpop.f32.mrb[0].mxu1 }
 0x3b2   : > { %v971_v23 = vmul.f32 0.35355338, %v964_v20  ;;  %v1992_v24 = vpop.f32.mrb[1].mxu1 }
 0x3b3   : > { %v967_v26 = vpop.f32.mrb[2].mxu1 }
 0x3b4   : > { %v972_v28 = vmul.f32 0.35355338, %v967_v26  ;;  %v1993_v29 = vpop.f32.mrb[3].mxu1  ;;  %v975_v31 = vadd.f32 %v973_v21, %v971_v23 }
 0x3b6   : > { %v978_v32 = vsel %vm977_vm3, %v975_v31, -inf  ;;  %v976_v33 = vadd.f32 %v974_v27, %v972_v28 }
 0x3b7   : > { %979 = vmax.xlane.f32.xlu0 %v978_v32 }
 0x3b8   : > { %v981_v34 = vsel %vm977_vm3, %v976_v33, -inf }
 0x3b9   : > { %982 = vmax.xlane.f32.xlu1 %v981_v34 }
 0x3ca   : > { %1132 = vrot.lane.b32.xlu1 %v1121_v52, %s2183_s27 }
 0x3cd   : > { %1130 = vrot.lane.b32.xlu0 %v1120_v57, %s2183_s27 }
 0x3ce   : > { %1136 = vrot.lane.b32.xlu1 %v1123_v63, %s2183_s27 }
 0x3d1   : > { %1134 = vrot.lane.b32.xlu0 %v1122_v1, %s2183_s27  ;;  %v1324_v1 = vld [vmem:[%s1321_s26 + $0x10] sm:$0xff] }
 0x3d2   : > { %v1328_v3 = vpack.c.bf16 %v1325_v2, %v1324_v1 }
 0x444   : > { %v980_v6 = vpop.xlane.xlu0 %979 }
 0x445   : > { %v984_v7 = vsub.f32 %v975_v31, %v980_v6 }
 0x446   : > { %v983_v8 = vpop.xlane.xlu1 %982 }
 0x447   : > { %v986_v9 = vmul.f32 1.442695, %v984_v7  ;;  %v985_v10 = vsub.f32 %v976_v33, %v983_v8 }
 0x448   : > { %v1131_v17 = vpop.permute.xlu0 %1130 }
 0x449   : > { %2119 = vpow2.f32 %v986_v9  ;;  %v988_v11 = vmul.f32 1.442695, %v985_v10 }
 0x44a   : > { %v1133_v18 = vpop.permute.xlu1 %1132 }
 0x44b   : > { %2121 = vpow2.f32 %v988_v11 }
 0x44c   : > { %v1135_v19 = vpop.permute.xlu0 %1134 }
 0x44e   : > { %v1137_v20 = vpop.permute.xlu1 %1136 }
 0x453   : > { %v2120_v14 = vpop.eup %2119 }
 0x454   : > { %2010 = vmatprep.mubr.msk.f32.mxu0 %vm977_vm3, %v2120_v14 }
 0x455   : > { %v2122_v16 = vpop.eup %2121 }
 0x456   : > { %2011 = vmatmul.mubr.msk.f32.vlgmr.msra.gmra.mrb[4].mxu0 %vm977_vm3, %v2122_v16 }
 0x457   : > { %2014 = vmatpush3.bf16.msra.mxu0 %v1124_v5  ;;  %2017 = vmatprep.mubr.msk.bf16.mxu0 %vm805_vm2, %v1131_v17 }
 0x458   : > { %2015 = vmatprep.subr.bf16.mxu0 %v1125_v15 }
 0x45b   : > { %2016 = vmatpush3.bf16.msra.mxu0 %v1125_v15 }
 0x45c   : > { %2025 = vmatprep.subr.bf16.mxu0 %v2179_v30 }
 0x45e   : > { %2018 = vmatmul.mubr.msk.bf16.vlgmr.msra.gmra.mrb[8].mxu0 %vm805_vm2, %v1133_v18 }
 0x45f   : > { %2021 = vmatprep.mubr.msk.bf16.mxu0 %vm805_vm2, %v1135_v19 }
 0x466   : > { %2022 = vmatmul.mubr.msk.bf16.gmra.mrb[12].mxu0 %vm805_vm2, %v1137_v20 }
 0x467   : > { %2033 = vmatprep.mubr.msk.bf16.mxu0 %vm2180_vm1, %v2179_v30 }
 0x529   : > { %v2012_v21 = vpop.f32.mrb[4].mxu0 }
 0x52a   : > { %2123 = vrcp.f32 %v2012_v21  ;;  %v1070_v22 = vpop.f32.mrb[5].mxu0 }
 0x52b   : > { %2125 = vrcp.f32 %v1070_v22 }
 0x531   : > { %v2019_v23 = vpop.f32.mrb[8].mxu0 }
 0x532   : > { %v1184_v24 = vpop.f32.mrb[9].mxu0 }
 0x533   : > { %v2020_v25 = vpop.f32.mrb[10].mxu0 }
 0x534   : > { %v2124_v26 = vpop.eup %2123  ;;  %v1217_v27 = vpack.c.bf16 %v2020_v25, %v2019_v23  ;;  %v1187_v28 = vpop.f32.mrb[11].mxu0 }
 0x535   : > { %v2126_v29 = vpop.eup %2125  ;;  %v1082_v31 = vmul.f32 %v2124_v26, %v2122_v16  ;;  %v1216_v32 = vpack.c.bf16 %v1187_v28, %v1184_v24  ;;  %v1891_v16 = vld [vmem:[%s1276_s0] ss:$0 sm:$0xff]  ;;  %s1414_s0 = scalar_lea.vmem %s2753_s16, %s2325_s2 }
 0x536   : > { %v1081_v33 = vmul.f32 %v2126_v29, %v2120_v14 }
 0x537   : > { %2026 = vmatpush3.bf16.msra.mxu0 %v1216_v32 }
 0x538   : > { %v1215_v34 = vpack.c.bf16 %v1082_v31, %v1081_v33  ;;  %2027 = vmatprep.subr.bf16.mxu0 %v2179_v30 }
 0x539   : > { %v2023_v35 = vpop.f32.mrb[12].mxu0 }
 0x53a   : > { %v1200_v36 = vpop.f32.mrb[13].mxu0 }
 0x53b   : > { %v2024_v37 = vpop.f32.mrb[14].mxu0  ;;  %2028 = vmatpush3.bf16.msra.mxu0 %v1217_v27 }
 0x53c   : > { %v1219_v38 = vpack.c.bf16 %v2024_v37, %v2023_v35  ;;  %v1203_v39 = vpop.f32.mrb[15].mxu0  ;;  %2029 = vmatprep.subr.bf16.mxu0 %v2179_v30 }
 0x53d   : > { %v1218_v40 = vpack.c.bf16 %v1203_v39, %v1200_v36 }
 0x53f   : > { %2030 = vmatpush3.bf16.msra.mxu0 %v1218_v40 }
 0x540   : > { %2031 = vmatprep.subr.bf16.mxu0 %v2179_v30 }
 0x543   : > { %2032 = vmatpush3.bf16.msra.mxu0 %v1219_v38 }
 0x546   : > { %2034 = vmatmul.mubr.msk.bf16.vlgmr.msra.gmra.mrb[16].mxu0 %vm977_vm3, %v1215_v34  ;;  %v1892_v34 = vld [vmem:[%s1329_s4] ss:$0 sm:$0xff] }
 0x619   : > { %v1265_v44 = vpop.f32.mrb[16].mxu0 }
 0x61a   : > { %v1266_v45 = vadd.f32 %v1888_v43, %v1265_v44  ;;  %v2035_v46 = vpop.f32.mrb[17].mxu0 }
 0x61b   : > { %v1268_v47 = vpop.f32.mrb[18].mxu0 }
 0x61c   : > { %v1269_v48 = vadd.f32 %v1888_v43, %v1268_v47  ;;  %v2036_v49 = vpop.f32.mrb[19].mxu0  ;;  %v1272_v50 = vadd.f32 %v1266_v45, %v2379_v41 }
 0x61e   : > { %v1278_v51 = vsel %vm805_vm2, %v1272_v50, 0.0  ;;  %v1273_v52 = vadd.f32 %v1269_v48, %v2381_v42  ;;  %v1322_v42 = vld [vmem:[%s1321_s26] sm:$0xff]  ;;  %s1400_s26 = scalar_lea.vmem %s2752_s15, %s1894_s6 }
 0x61f   : > { %1279 = vadd.xlane.f32.xlu0 %v1278_v51  ;;  %v1327_v59 = vpack.c.bf16 %v1323_v56, %v1322_v42  ;;  %v1401_v21 = vld [vmem:[%s1400_s26] sm:$0xff]  ;;  %v1402_v22 = vld [vmem:[%s1400_s26 + $0x8] sm:$0xff]  ;;  %v1403_v24 = vld [vmem:[%s1400_s26 + $0x10] sm:$0xff] }
 0x620   : > { %v1281_v53 = vsel %vm805_vm2, %v1273_v52, 0.0  ;;  %v1410_v23 = vpack.c.bf16 %v1402_v22, %v1401_v21  ;;  %v1404_v25 = vld [vmem:[%s1400_s26 + $0x18] sm:$0xff]  ;;  %v1405_v27 = vld [vmem:[%s1400_s26 + $0x20] sm:$0xff]  ;;  %v1406_v28 = vld [vmem:[%s1400_s26 + $0x28] sm:$0xff] }
 0x621   : > { %1282 = vadd.xlane.f32.xlu1 %v1281_v53  ;;  %2038 = vmatpush3.bf16.msra.mxu1 %v1327_v59  ;;  %v1411_v26 = vpack.c.bf16 %v1404_v25, %v1403_v24  ;;  %v1412_v29 = vpack.c.bf16 %v1406_v28, %v1405_v27  ;;  %v1407_v31 = vld [vmem:[%s1400_s26 + $0x30] sm:$0xff]  ;;  %v1408_v32 = vld [vmem:[%s1400_s26 + $0x38] sm:$0xff] }
 0x622   : > { %2039 = vmatprep.subr.bf16.mxu1 %v2179_v30  ;;  %v1413_v33 = vpack.c.bf16 %v1408_v32, %v1407_v31 }
 0x625   : > { %2040 = vmatpush3.bf16.msra.mxu1 %v1328_v3 }
 0x626   : > { %2045 = vmatprep.subr.bf16.mxu1 %v2179_v30 }
 0x6ac   : > { %v1280_v54 = vpop.xlane.xlu0 %1279 }
 0x6ad   : > { %v1285_v55 = vmul.f32 0.03125, %v1280_v54 }
 0x6ae   : > { %v1283_v57 = vpop.xlane.xlu1 %1282 }
 0x6af   : > { %v1287_v58 = vsub.f32 %v1272_v50, %v1285_v55  ;;  %v1286_v60 = vmul.f32 0.03125, %v1283_v57 }
 0x6b1   : > { %v1288_v61 = vsub.f32 %v1273_v52, %v1286_v60  ;;  %v1289_v62 = vmul.f32 %v1287_v58, %v1287_v58 }
 0x6b3   : > { %v1291_v63 = vsel %vm805_vm2, %v1289_v62, 0.0  ;;  %v1290_v0 = vmul.f32 %v1288_v61, %v1288_v61 }
 0x6b4   : > { %1292 = vadd.xlane.f32.xlu0 %v1291_v63  ;;  %v1895_v63 = vld [vmem:[%s1414_s0] ss:$0 sm:$0xff] }
 0x6b5   : > { %v1294_v41 = vsel %vm805_vm2, %v1290_v0, 0.0 }
 0x6b8   : > { %1295 = vadd.xlane.f32.xlu0 %v1294_v41 }
 0x741   : > { %v1293_v4 = vpop.xlane.xlu0 %1292 }
 0x742   : > { %v1297_v5 = vmul.f32 0.03125, %v1293_v4 }
 0x744   : > { %v1299_v6 = vadd.f32 1e-12, %v1297_v5 }
 0x745   : > { %v1296_v7 = vpop.xlane.xlu0 %1295 }
 0x746   : > { %2127 = vrsqrt.f32 %v1299_v6  ;;  %v1298_v8 = vmul.f32 0.03125, %v1296_v7 }
 0x748   : > { %v1300_v9 = vadd.f32 1e-12, %v1298_v8 }
 0x74a   : > { %2129 = vrsqrt.f32 %v1300_v9 }
 0x750   : > { %v2128_v10 = vpop.eup %2127 }
 0x751   : > { %v1303_v11 = vmul.f32 %v2128_v10, %v1287_v58 }
 0x753   : > { %v1311_v14 = vmul.f32 %v1890_v12, %v1303_v11 }
 0x754   : > { %v2130_v13 = vpop.eup %2129 }
 0x755   : > { %v1304_v15 = vmul.f32 %v2130_v13, %v1288_v61  ;;  %v2523_v18 = vadd.f32 %v1891_v16, %v1311_v14 }
 0x757   : > { %v1312_v17 = vmul.f32 %v1890_v12, %v1304_v15 }
 0x759   : > { %v2525_v19 = vadd.f32 %v1891_v16, %v1312_v17 }
 0x75b   : > { %v1326_v20 = vpack.c.bf16 %v2525_v19, %v2523_v18 }
 0x75d   : > { %2042 = vmatmul.mubr.msk.bf16.vlgmr.msra.gmra.mrb[4].mxu1 %vm805_vm2, %v1326_v20 }
 0x75e   : > { %2053 = vmatprep.mubr.msk.bf16.mxu1 %vm2180_vm1, %v2179_v30  ;;  %2046 = vmatpush3.bf16.msra.mxu1 %v1410_v23  ;;  %v1897_v23 = vld [vmem:[%s1468_s3] ss:$0 sm:$0xff]  ;;  %s2788_s3 = sld [smem:[#allocation10_spill]] (!%p1899_p4) }
 0x75f   : > { %2047 = vmatprep.subr.bf16.mxu1 %v2179_v30 }
 0x762   : > { %2048 = vmatpush3.bf16.msra.mxu1 %v1411_v26  ;;  %v1898_v26 = vld [vmem:[%s1470_s28] ss:$0 sm:$0xff] }
 0x763   : > { %2049 = vmatprep.subr.bf16.mxu1 %v2179_v30 }
 0x766   : > { %2050 = vmatpush3.bf16.msra.mxu1 %v1412_v29 }
 0x767   : > { %2051 = vmatprep.subr.bf16.mxu1 %v2179_v30 }
 0x76a   : > { %2052 = vmatpush3.bf16.msra.mxu1 %v1413_v33 }
 0x830   : > { %v1374_v35 = vpop.f32.mrb[4].mxu1 }
 0x831   : > { %v1375_v36 = vadd.f32 %v1892_v34, %v1374_v35  ;;  %v2043_v37 = vpop.f32.mrb[5].mxu1  ;;  %v2184_v35 = vmov (!%p1899_p4), 0.0|0.0  }
 0x832   : > { %v1377_v38 = vpop.f32.mrb[6].mxu1  ;;  %2088 = vmatprep.subr.bf16.mxu0 (!%p1899_p4), %v2184_v35  ;;  %v1596_v37 = vld [vmem:[%s2756_s19 + $0x8] sm:$0xff] (!%p1899_p4) }
 0x833   : > { %v1383_v39 = vmul.f32 0.044715, %v1375_v36  ;;  %v1378_v40 = vadd.f32 %v1892_v34, %v1377_v38  ;;  %v2044_v43 = vpop.f32.mrb[7].mxu1  ;;  %v1381_v55 = vmul.f32 0.5, %v1375_v36  ;;  %v1595_v34 = vld [vmem:[%s2756_s19] sm:$0xff] (!%p1899_p4) }
 0x834   : > { %v1520_v38 = vld [vmem:[%s2788_s3] sm:$0x3] (!%p1899_p4)  ;;  %v1598_v43 = vld [vmem:[%s2756_s19 + $0x18] sm:$0xff] (!%p1899_p4) }
 0x835   : > { %v1385_v44 = vmul.f32 %v1383_v39, %v1375_v36  ;;  %v1384_v45 = vmul.f32 0.044715, %v1378_v40  ;;  %v1382_v57 = vmul.f32 0.5, %v1378_v40  ;;  %v1600_v39 = vpack.c.bf16 (!%p1899_p4), %v1596_v37, %v1595_v34 }
 0x837   : > { %v1387_v46 = vmul.f32 %v1385_v44, %v1375_v36  ;;  %v1386_v47 = vmul.f32 %v1384_v45, %v1378_v40 }
 0x839   : > { %v1389_v48 = vadd.f32 %v1387_v46, %v1375_v36  ;;  %v1388_v49 = vmul.f32 %v1386_v47, %v1378_v40  ;;  %v2186_v36 = vmov (!%p1899_p4), 0.0  }
 0x83a   : > { %2061 = vmatprep.mubr.msk.f32.mxu0 (!%p1899_p4), %vm2185_vm4, %v2186_v36 }
 0x83b   : > { %v1391_v30 = vmul.f32 0.7978846, %v1389_v48  ;;  %v1390_v50 = vadd.f32 %v1388_v49, %v1378_v40  ;;  %v1597_v40 = vld [vmem:[%s2756_s19 + $0x10] sm:$0xff] (!%p1899_p4)  ;;  %v1654_v48 = vld [vmem:[%s2758_s21 + $0x8] sm:$0xff] (!%p1899_p4)  ;;  %v1656_v49 = vld [vmem:[%s2758_s21 + $0x18] sm:$0xff] (!%p1899_p4) }
 0x83c   : > { %v1601_v44 = vpack.c.bf16 (!%p1899_p4), %v1598_v43, %v1597_v40  ;;  %v1753_v40 = vld [vmem:[%s2760_s23 + $0xe8] sm:$0xff] (!%p1899_p4) }
 0x83d   : > { %2131 = vtanh.f32 %v1391_v30  ;;  %v1392_v51 = vmul.f32 0.7978846, %v1390_v50  ;;  %v1663_v30 = vpack.c.bf16 (!%p1899_p4), %v1656_v49, %v1654_v48  ;;  %v1653_v50 = vld [vmem:[%s2758_s21] sm:$0xff] (!%p1899_p4)  ;;  %v1755_v48 = vld [vmem:[%s2760_s23 + $0xf8] sm:$0xff] (!%p1899_p4) }
 0x83f   : > { %2133 = vtanh.f32 %v1392_v51  ;;  %v1655_v51 = vld [vmem:[%s2758_s21 + $0x10] sm:$0xff] (!%p1899_p4) }
 0x847   : > { %v2132_v52 = vpop.eup %2131 }
 0x848   : > { %v1395_v53 = vadd.f32 1.0, %v2132_v52  ;;  %v1662_v52 = vpack.c.bf16 (!%p1899_p4), %v1655_v51, %v1653_v50  ;;  %v1739_v50 = vld [vmem:[%s2760_s23 + $0x78] sm:$0xff] (!%p1899_p4) }
 0x849   : > { %v2134_v54 = vpop.eup %2133 }
 0x84a   : > { %v1396_v58 = vadd.f32 1.0, %v2134_v54  ;;  %v1397_v60 = vmul.f32 %v1395_v53, %v1381_v55  ;;  %v1658_v53 = vld [vmem:[%s2758_s21 + $0x28] sm:$0xff] (!%p1899_p4)  ;;  %v1660_v54 = vld [vmem:[%s2758_s21 + $0x38] sm:$0xff] (!%p1899_p4) }
 0x84b   : > { %v1665_v55 = vpack.c.bf16 (!%p1899_p4), %v1660_v54, %v1658_v53 }
 0x84c   : > { %v1398_v61 = vmul.f32 %v1396_v58, %v1382_v57  ;;  %v1657_v57 = vld [vmem:[%s2758_s21 + $0x20] sm:$0xff] (!%p1899_p4)  ;;  %v1659_v58 = vld [vmem:[%s2758_s21 + $0x30] sm:$0xff] (!%p1899_p4) }
 0x84e   : > { %v1409_v62 = vpack.c.bf16 %v1398_v61, %v1397_v60  ;;  %v1664_v60 = vpack.c.bf16 (!%p1899_p4), %v1659_v58, %v1657_v57  ;;  %v2187_v61 = vmov (!%p1899_p4), 0  }
 0x850   : > { %2054 = vmatmul.mubr.msk.bf16.vlgmr.msra.gmra.mrb[8].mxu1 %vm977_vm3, %v1409_v62  ;;  %v1740_v62 = vld [vmem:[%s2760_s23 + $0x80] sm:$0xff] (!%p1899_p4) }
 0x923   : > { %v1459_v0 = vpop.f32.mrb[8].mxu1 }
 0x924   : > { %v1460_v41 = vadd.f32 %v1895_v63, %v1459_v0  ;;  %v2055_v42 = vpop.f32.mrb[9].mxu1  ;;  %v1724_v0 = vld [vmem:[%s2760_s23] sm:$0xff] (!%p1899_p4) }
 0x925   : > { %v1462_v56 = vpop.f32.mrb[10].mxu1  ;;  %v1725_v42 = vld [vmem:[%s2760_s23 + $0x8] sm:$0xff] (!%p1899_p4) }
 0x926   : > { %v1463_v59 = vadd.f32 %v1895_v63, %v1462_v56  ;;  %v2056_v1 = vpop.f32.mrb[11].mxu1  ;;  %v1466_v2 = vadd.f32 %v1460_v41, %v2523_v18  ;;  %v1741_v63 = vld [vmem:[%s2760_s23 + $0x88] sm:$0xff] (!%p1899_p4)  ;;  %v1742_v56 = vld [vmem:[%s2760_s23 + $0x90] sm:$0xff] (!%p1899_p4) }
 0x927   : > { %v1766_v41 = vpack.c.bf16 (!%p1899_p4), %v1741_v63, %v1740_v62  ;;  %v1758_v1 = vpack.c.bf16 (!%p1899_p4), %v1725_v42, %v1724_v0 }
 0x928   : > { %v1472_v3 = vsel %vm805_vm2, %v1466_v2, 0.0  ;;  %v1467_v4 = vadd.f32 %v1463_v59, %v2525_v19  ;;  %v1743_v59 = vld [vmem:[%s2760_s23 + $0x98] sm:$0xff] (!%p1899_p4) }
 0x929   : > { %1473 = vadd.xlane.f32.xlu1 %v1472_v3  ;;  %v1726_v3 = vld [vmem:[%s2760_s23 + $0x10] sm:$0xff] (!%p1899_p4)  ;;  %1952 = vmatprep.subr.bf16.mxu1 (!%p1899_p4), %v1766_v41 }
 0x92a   : > { %v1475_v5 = vsel %vm805_vm2, %v1467_v4, 0.0  ;;  %1953 = vmatpush3.bf16.msra.mxu1 (!%p1899_p4), %v1758_v1 }
 0x92b   : > { %1476 = vadd.xlane.f32.xlu0 %v1475_v5  ;;  %v1744_v5 = vld [vmem:[%s2760_s23 + $0xa0] sm:$0xff] (!%p1899_p4) }
 0x9b6   : > { %v1474_v6 = vpop.xlane.xlu1 %1473 }
 0x9b7   : > { %v1478_v7 = vmul.f32 0.03125, %v1474_v6  ;;  %v1745_v6 = vld [vmem:[%s2760_s23 + $0xa8] sm:$0xff] (!%p1899_p4) }
 0x9b8   : > { %v1477_v8 = vpop.xlane.xlu0 %1476 }
 0x9b9   : > { %v1480_v9 = vsub.f32 %v1466_v2, %v1478_v7  ;;  %v1479_v10 = vmul.f32 0.03125, %v1477_v8  ;;  %v1767_v2 = vpack.c.bf16 (!%p1899_p4), %v1743_v59, %v1742_v56  ;;  %v1768_v8 = vpack.c.bf16 (!%p1899_p4), %v1745_v6, %v1744_v5 }
 0x9bb   : > { %v1481_v11 = vsub.f32 %v1467_v4, %v1479_v10  ;;  %v1482_v12 = vmul.f32 %v1480_v9, %v1480_v9  ;;  %v1727_v4 = vld [vmem:[%s2760_s23 + $0x18] sm:$0xff] (!%p1899_p4)  ;;  %1954 = vmatprep.subr.bf16.mxu1 (!%p1899_p4), %v1767_v2  ;;  %v1729_v10 = vld [vmem:[%s2760_s23 + $0x28] sm:$0xff] (!%p1899_p4) }
 0x9bc   : > { %v1759_v7 = vpack.c.bf16 (!%p1899_p4), %v1727_v4, %v1726_v3  ;;  %v1904_v4 = vld [vmem:[%s2761_s24] ss:$0 sm:$0xff] (!%p1899_p4) }
 0x9bd   : > { %v1484_v13 = vsel %vm805_vm2, %v1482_v12, 0.0  ;;  %v1483_v14 = vmul.f32 %v1481_v11, %v1481_v11  ;;  %v1747_v12 = vld [vmem:[%s2760_s23 + $0xb8] sm:$0xff] (!%p1899_p4) }
 0x9be   : > { %1485 = vadd.xlane.f32.xlu1 %v1484_v13  ;;  %1955 = vmatpush3.bf16.msra.mxu1 (!%p1899_p4), %v1759_v7 }
 0x9bf   : > { %v1487_v15 = vsel %vm805_vm2, %v1483_v14, 0.0  ;;  %1956 = vmatprep.subr.bf16.mxu1 (!%p1899_p4), %v1768_v8 }
 0x9c0   : > { %1488 = vadd.xlane.f32.xlu0 %v1487_v15  ;;  %v1730_v15 = vld [vmem:[%s2760_s23 + $0x30] sm:$0xff] (!%p1899_p4) }
 0xa4b   : > { %v1486_v16 = vpop.xlane.xlu1 %1485 }
 0xa4c   : > { %v1490_v17 = vmul.f32 0.03125, %v1486_v16  ;;  %v1731_v16 = vld [vmem:[%s2760_s23 + $0x38] sm:$0xff] (!%p1899_p4) }
 0xa4d   : > { %v1489_v18 = vpop.xlane.xlu0 %1488 }
 0xa4e   : > { %v1492_v19 = vadd.f32 1e-12, %v1490_v17  ;;  %v1491_v20 = vmul.f32 0.03125, %v1489_v18  ;;  %v1748_v17 = vld [vmem:[%s2760_s23 + $0xc0] sm:$0xff] (!%p1899_p4)  ;;  %v1749_v18 = vld [vmem:[%s2760_s23 + $0xc8] sm:$0xff] (!%p1899_p4) }
 0xa50   : > { %2135 = vrsqrt.f32 %v1492_v19  ;;  %v1493_v21 = vadd.f32 1e-12, %v1491_v20  ;;  %v1761_v19 = vpack.c.bf16 (!%p1899_p4), %v1731_v16, %v1730_v15  ;;  %v1770_v20 = vpack.c.bf16 (!%p1899_p4), %v1749_v18, %v1748_v17 }
 0xa52   : > { %2137 = vrsqrt.f32 %v1493_v21  ;;  %v1732_v21 = vld [vmem:[%s2760_s23 + $0x40] sm:$0xff] (!%p1899_p4) }
 0xa5a   : > { %v2136_v22 = vpop.eup %2135 }
 0xa5b   : > { %v1496_v24 = vmul.f32 %v2136_v22, %v1480_v9  ;;  %v1728_v9 = vld [vmem:[%s2760_s23 + $0x20] sm:$0xff] (!%p1899_p4)  ;;  %v1733_v22 = vld [vmem:[%s2760_s23 + $0x48] sm:$0xff] (!%p1899_p4) }
 0xa5c   : > { %v2138_v25 = vpop.eup %2137  ;;  %v1760_v13 = vpack.c.bf16 (!%p1899_p4), %v1729_v10, %v1728_v9 }
 0xa5d   : > { %v1504_v27 = vmul.f32 %v1897_v23, %v1496_v24  ;;  %v1497_v28 = vmul.f32 %v2138_v25, %v1481_v11  ;;  %1519 = sbr.rel (%p1899_p4) target bundleno = 3543 (0xdd7), region = 128  ;;  %v1746_v11 = vld [vmem:[%s2760_s23 + $0xb0] sm:$0xff] (!%p1899_p4)  ;;  %v1751_v24 = vld [vmem:[%s2760_s23 + $0xd8] sm:$0xff] (!%p1899_p4)  ;;  %v1762_v25 = vpack.c.bf16 (!%p1899_p4), %v1733_v22, %v1732_v21 }
 0xa5e   : > { %v1769_v14 = vpack.c.bf16 (!%p1899_p4), %v1747_v12, %v1746_v11  ;;  %1957 = vmatpush3.bf16.msra.mxu1 (!%p1899_p4), %v1760_v13 }
 0xa5f   : > { %v1512_v29 = vadd.f32 %v1898_v26, %v1504_v27  ;;  %v1505_v31 = vmul.f32 %v1897_v23, %v1497_v28  ;;  %v1750_v23 = vld [vmem:[%s2760_s23 + $0xd0] sm:$0xff] (!%p1899_p4)  ;;  %v1735_v28 = vld [vmem:[%s2760_s23 + $0x58] sm:$0xff] (!%p1899_p4) }
 0xa60   : > { %1958 = vmatprep.subr.bf16.mxu1 (!%p1899_p4), %v1769_v14  ;;  %v1734_v27 = vld [vmem:[%s2760_s23 + $0x50] sm:$0xff] (!%p1899_p4) }
 0xa61   : > { %1514 = vst.msk [vmem:[#allocation2] sm:$0xff] %vm805_vm2, %v1512_v29  ;;  %v1513_v32 = vadd.f32 %v1898_v26, %v1505_v31  ;;  %v1771_v26 = vpack.c.bf16 (!%p1899_p4), %v1751_v24, %v1750_v23  ;;  %v1901_v31 = vld [vmem:[%s2757_s20] ss:$0 sm:$0xff] (!%p1899_p4) }
 0xa62   : > { %1959 = vmatpush3.bf16.msra.mxu1 (!%p1899_p4), %v1761_v19 }
 0xa63   : > { %1515 = vst.msk [vmem:[#allocation2 + $0x8] sm:$0xff] %vm805_vm2, %v1513_v32  ;;  %v2089_v33 = vpack.c.bf16 (!%p1899_p4), %v1513_v32, %v1512_v29  ;;  %1960 = vmatprep.subr.bf16.mxu1 (!%p1899_p4), %v1770_v20  ;;  %v1763_v29 = vpack.c.bf16 (!%p1899_p4), %v1735_v28, %v1734_v27 }
 0xa65   : > { %2090 = vmatpush3.bf16.msra.mxu0 %v2089_v33 }
 0xa66   : > { %2064 = vmatprep.subr.bf16.mxu0 %v2186_v36  ;;  %1961 = vmatpush3.bf16.msra.mxu1 %v1762_v25 }
 0xa67   : > { %1962 = vmatprep.subr.bf16.mxu1 %v1771_v26 }
 0xa68   : > { %2062 = vmatmul.mubr.msk.f32.vlgmr.msra.gmra.mrb[0].mxu0 %vm1521_vm5, %v1520_v38 }
 0xa69   : > { %2065 = vmatpush3.bf16.msra.mxu0 %v1600_v39  ;;  %2068 = vmatprep.mubr.msk.bf16.mxu0 %vm2185_vm4, %v2186_v36  ;;  %v1752_v39 = vld [vmem:[%s2760_s23 + $0xe0] sm:$0xff] }
 0xa6a   : > { %2066 = vmatprep.subr.bf16.mxu0 %v2186_v36  ;;  %1963 = vmatpush3.bf16.msra.mxu1 %v1763_v29  ;;  %v1772_v43 = vpack.c.bf16 %v1753_v40, %v1752_v39 }
 0xa6c   : > { %1964 = vmatprep.subr.bf16.mxu1 %v1772_v43 }
 0xa6d   : > { %2067 = vmatpush3.bf16.msra.mxu0 %v1601_v44  ;;  %v1736_v44 = vld [vmem:[%s2760_s23 + $0x60] sm:$0xff] }
 0xa6e   : > { %1681 = vmatprep.subr.bf16.mxu0 %v1663_v30  ;;  %v1738_v30 = vld [vmem:[%s2760_s23 + $0x70] sm:$0xff] }
 0xa6f   : > { %v1765_v51 = vpack.c.bf16 %v1739_v50, %v1738_v30 }
 0xb3b   : > { %v1591_v45 = vpop.f32.mrb[0].mxu0 }
 0xb3c   : > { %v1599_v46 = vpack.c.bf16 %v1591_v45, %v1591_v45  ;;  %v2063_v47 = vpop.f32.mrb[1].mxu0  ;;  %v1737_v45 = vld [vmem:[%s2760_s23 + $0x68] sm:$0xff] }
 0xb3d   : > { %v1754_v47 = vld [vmem:[%s2760_s23 + $0xf0] sm:$0xff] }
 0xb3e   : > { %2069 = vmatmul.mubr.msk.bf16.vlgmr.msra.gmra.mrb[4].mxu0 %vm805_vm2, %v1599_v46  ;;  %v1764_v46 = vpack.c.bf16 %v1737_v45, %v1736_v44  ;;  %v1773_v49 = vpack.c.bf16 %v1755_v48, %v1754_v47 }
 0xb3f   : > { %1682 = vmatpush1.bf16.msra.mxu0 %v1662_v52  ;;  %1713 = vmatprep.mubr.bf16.mxu0 %v2187_v61  ;;  %v1668_v52 = vlaneseq }
 0xb40   : > { %1683 = vmatprep.subr.bf16.mxu0 %v1665_v55  ;;  %1965 = vmatpush3.bf16.msra.mxu1 %v1764_v46  ;;  %v1666_v55 = vld [vmem:[%s2759_s22] sm:$0x3] }
 0xb41   : > { %1966 = vmatprep.subr.bf16.mxu1 %v1773_v49  ;;  %v1669_v53 = vshrl.u32 %v1668_v52, 7 }
 0xb43   : > { %1684 = vmatpush1.bf16.msra.mxu0 %v1664_v60  ;;  %v1670_v54 = vsub.s32 0, %v1669_v53  ;;  %v1674_v57 = vsub.s32 1, %v1669_v53 }
 0xb44   : > { %1967 = vmatpush3.bf16.msra.mxu1 %v1765_v51 }
 0xb45   : > { %v1671_v58 = vrot.slane %v1666_v55, %v1670_v54  ;;  %v1675_v60 = vrot.slane %v1666_v55, %v1674_v57 }
 0xc11   : > { %v1646_v32 = vpop.f32.mrb[4].mxu0 }
 0xc12   : > { %v1647_v33 = vadd.f32 %v1901_v31, %v1646_v32  ;;  %v2070_v34 = vpop.f32.mrb[5].mxu0 }
 0xc13   : > { %v1649_v35 = vpop.f32.mrb[6].mxu0 }
 0xc14   : > { %2139 = vtanh.f32 %v1647_v33  ;;  %v2071_v36 = vpop.f32.mrb[7].mxu0 }
 0xc1e   : > { %v2140_v37 = vpop.eup %2139 }
 0xc1f   : > { %v1661_v38 = vpack.c.bf16 %v2140_v37, %v2140_v37 }
 0xc21   : > { %1903 = vmatmul.mubr.msk.bf16.vlgmr.msra.gmra.mrb[8].mxu0 %vm805_vm2, %v1661_v38 }
 0xcf4   : > { %v1715_v61 = vpop.f32.mrb[8].mxu0 }
 0xcf5   : > { %v1716_v62 = vadd.f32 %v1715_v61, %v1671_v58  ;;  %v1717_v63 = vpop.f32.mrb[9].mxu0 }
 0xcf6   : > { %v1718_v0 = vadd.f32 %v1717_v63, %v1675_v60  ;;  %v1719_v41 = vpop.f32.mrb[10].mxu0 }
 0xcf7   : > { %v1722_v42 = vmax.f32 %v1716_v62, 0.0  ;;  %v1720_v56 = vpop.f32.mrb[11].mxu0 }
 0xcf8   : > { %v1723_v59 = vmax.f32 %v1718_v0, 0.0 }
 0xcf9   : > { %v1756_v2 = vpack.c.bf16 %v1722_v42, %v1722_v42 }
 0xcfa   : > { %v1757_v1 = vpack.c.bf16 %v1723_v59, %v1723_v59 }
 0xcfc   : > { %1813 = vmatprep.mubr.bf16.mxu1 %v1757_v1 }
 0xcfd   : > { %1814 = vmatmul.mubr.bf16.vlgmr.msra.gmra.mrb[0].mxu1 %v1756_v2 }
 0xdd0   : > { %v1968_v3 = vpop.f32.mrb[0].mxu1 }
 0xdd1   : > { %v1969_v5 = vpop.f32.mrb[1].mxu1 }
 0xdd2   : > { %v1970_v6 = vadd.f32 %v1969_v5, %v1968_v3  ;;  %v1971_v7 = vpop.f32.mrb[2].mxu1 }
 0xdd3   : > { %v1972_v8 = vpop.f32.mrb[3].mxu1 }
 0xdd4   : > { %v1816_v9 = vadd.f32 %v1970_v6, %v1904_v4 }
 0xdd6   : > { %1821 = vst [vmem:[#allocation3] sm:$0x3] %v1816_v9 }
 0xdd7 PF: > { %p2095_p5 = scmp.eq.s32.totalorder %s2325_s2, 1  ;;  %s2188_s9 = smov [#allocation3]  }
 0xdd8   : > { %s1829_s27 = sshll.u32 %s2188_s9, 4  ;;  %s1830_s27 = int_to_ptr.vmem [resolvable:$true] %s1829_s27 }
 0xdd9   : > { %s2141_s0 = scalar_lea.vmem %s1830_s27, 32  ;;  %p2148_p9 = scmp.lt.s32.totalorder %s1830_s27, %s1830_s27 }
 0xdda   : > { %p2142_p6 = scmp.ne.s32.totalorder %s1830_s27, %s2141_s0  ;;  %p2149_p10 = scmp.lt.s32.totalorder %s2141_s0, %s2141_s0 }
 0xddc   : > { %p2143_p7 = pnand %p2142_p6, %p2095_p5  ;;  %p2150_p11 = por %p2149_p10, %p2148_p9 }
 0xdde   : > { %p2144_p8 = pneg %p2143_p7 }
 0xde0   : > { %p2151_p12 = pnand %p2150_p11, %p2144_p8 }
 0xde2   : > { %2154 = shalt.err (!%p2151_p12)
}
 0xde3   : > { %s2155_s1 = scalar_lea.hbm %s2762_s25, 32 }
 0xde4   : > { %p2156_p13 = scmp.ne.s32.totalorder %s2762_s25, %s2155_s1  ;;  %p2161_p2 = scmp.lt.u32.totalorder %s2155_s1, %s2762_s25 }
 0xde6   : > { %p2157_p0 = pnand %p2156_p13, %p2095_p5 }
 0xde8   : > { %p2158_p1 = pneg %p2157_p0 }
 0xdea   : > { %p2163_p3 = pnand %p2161_p2, %p2158_p1 }
 0xdec   : > { %2166 = shalt.err (!%p2163_p3)
}
 0xded   : > { %2092 = dma.vmem_to_hbm [thread:$0]  (%p2095_p5), %s1830_s27, 32, %s2762_s25, [#allocation4]  }
 0xdee   : > { %2172 = dma.done.wait (%p2095_p5), [#allocation4], 32  }
 0xdef   : > { %2174 = vsyncadd (%p2095_p5), [#allocation4], 4294967264 }
 0xdf0 PF: > { %s36_s29 = sadd.s32 1, %s2177_s29  }
 0xdf1   : > { %p33_p4 = scmp.ge.s32.totalorder %s36_s29, 4  }
 0xdf3   :  { %35 = sbr.rel (!%p33_p4) target bundleno = 12 (0xc), region = 164 }
 0xdfa   :  { %1842 = vsyncpa [#allocation4], 1 }
 0xdfb   :  { %1844 = vsyncpa [#allocation4 + $0x1], 1 }

</bundles_post_ra>
